<compile_context>
chip_gen: v6e
topology: v6e:2x2x1
jax: 0.10.0
libtpu: 0.0.40
codegen_flags: <defaults>
</compile_context>

<pallas_src>
import functools

import jax
import jax.numpy as jnp
from jax.experimental import pallas as pl
from jax.experimental.pallas import tpu as pltpu


def self_attention_kernel(x_ref, w_ref, b_ref, gamma_ref, o_ref,
                          q_sc, kt_sc, v_sc, *, c8p):
    qi = pl.program_id(1)
    tq = o_ref.shape[-1]

    # Stacked Q/K/V projection: one MXU matmul, once per batch element, reused by
    # every query tile.
    @pl.when(qi == 0)
    def _():
        x_bf = x_ref[...].astype(jnp.bfloat16)                              # [C, N]
        qkv = jnp.dot(w_ref[...], x_bf,
                      preferred_element_type=jnp.float32) + b_ref[...]      # [R, N] f32
        q_sc[...] = qkv[:c8p, :].astype(jnp.bfloat16)                       # [C8p, N]
        # K stored transposed -> per-tile energy matmul is a plain NN matmul;
        # this small once-per-batch transpose is the only XLU transpose.
        kt_sc[...] = jnp.transpose(qkv[c8p:2 * c8p, :]).astype(jnp.bfloat16)  # [N, C8p]
        v_sc[...] = qkv[2 * c8p:, :].astype(jnp.bfloat16)                   # [C, N]

    start = pl.multiple_of(qi * tq, tq)
    xq = x_ref[:, pl.ds(start, tq)]                                         # [C, TQ]   f32
    q_tile = q_sc[:, pl.ds(start, tq)]                                      # [C8p, TQ] bf16

    # energy^T[j, i] = sum_c k[c, j] * q[c, i]   -> [N, TQ]   (NN matmul, MXU)
    energy_t = jnp.dot(kt_sc[...], q_tile, preferred_element_type=jnp.float32)

    # Exact softmax over the key axis (axis 0); elementwise math kept in f32.
    m = jnp.max(energy_t, axis=0, keepdims=True)                            # [1, TQ]
    p = jnp.exp(energy_t - m)                                               # [N, TQ] f32
    s = jnp.sum(p, axis=0, keepdims=True)                                   # [1, TQ] f32

    # out_unnorm[c, i] = sum_j v[c, j] * p[j, i]  -> [C, TQ]   (NN matmul, MXU)
    out = jnp.dot(v_sc[...], p.astype(jnp.bfloat16),
                  preferred_element_type=jnp.float32)

    # Deferred softmax normalization + gamma folded into one [1, TQ] scale.
    scale = gamma_ref[0, 0] * pl.reciprocal(s, approx=True)
    o_ref[...] = (out * scale + xq).astype(o_ref.dtype)


def _stack_qkv_params(wq, bq, wk, bk, wv, bv):
    """Stack the three 1x1-conv weights/biases into one [R, C] weight / [R, 1] bias.

    Q/K segments are zero-padded to a multiple of 8 rows: padded rows have zero
    weight AND zero bias, so they contribute exactly 0 to the energy matmul while
    keeping all in-kernel row slices sublane-aligned.
    """
    c8, c = wq.shape
    c8p = ((c8 + 7) // 8) * 8
    rows = 2 * c8p + c
    w = jnp.zeros((rows, c), jnp.float32)
    w = w.at[:c8].set(wq)
    w = w.at[c8p:c8p + c8].set(wk)
    w = w.at[2 * c8p:].set(wv)
    b = jnp.zeros((rows, 1), jnp.float32)
    b = b.at[:c8].set(bq)
    b = b.at[c8p:c8p + c8].set(bk)
    b = b.at[2 * c8p:].set(bv)
    return w.astype(jnp.bfloat16), b, c8p


def _default_tq():
    try:
        kind = jax.devices()[0].device_kind.lower()
    except Exception:
        kind = ""
    # v5* MXUs are 128 wide -> 256-wide output tiles buy nothing there.
    return 128 if "v5" in kind else 256


def self_attention(x, params, *, tq=None):
    """x: [B, C, H, W] (NCHW, as in the PyTorch module)."""
    wq, bq, wk, bk, wv, bv, gamma = params
    B, C, H, W = x.shape
    N = H * W

    w_qkv, b_qkv, C8p = _stack_qkv_params(wq, bq, wk, bk, wv, bv)
    R = w_qkv.shape[0]

    if tq is None:
        tq = _default_tq()
    tq = min(tq, N)
    while N % tq:
        tq //= 2
    assert tq >= 1 and N % tq == 0

    x3 = x.reshape(B, C, N).astype(jnp.float32)   # metadata reshape only, no transpose

    const = lambda shape: pl.BlockSpec(shape, lambda b, qi: tuple(0 for _ in shape))

    # VMEM budget (bytes): double-buffered x/out blocks, weights, bf16 scratch and
    # the f32 projection / energy / exp temporaries.
    est = (2 * C * N * 4 + 2 * C * tq * 4 + 2 * R * C * 2 + 2 * R * 128 * 4
           + (2 * C8p + C) * N * 2 + R * N * 4 + 3 * N * tq * 4)
    vmem_limit = min(64 * 1024 * 1024, max(int(est * 1.25), 16 * 1024 * 1024))

    cost = pl.CostEstimate(
        flops=2 * B * N * (R * C + (C8p + C) * N),
        transcendentals=B * N * N,
        bytes_accessed=2 * B * C * N * 4 + R * C * 2 + R * 4 + 4,
    )

    kernel = functools.partial(self_attention_kernel, c8p=C8p)

    out = pl.pallas_call(
        kernel,
        out_shape=jax.ShapeDtypeStruct((B, C, N), jnp.float32),
        grid_spec=pltpu.PrefetchScalarGridSpec(
            num_scalar_prefetch=0,
            grid=(B, N // tq),
            in_specs=[
                pl.BlockSpec((None, C, N), lambda b, qi: (b, 0, 0)),   # x (full per batch)
                const((R, C)),                                         # stacked Wqkv (bf16)
                const((R, 1)),                                         # stacked bias (f32)
                pl.BlockSpec(memory_space=pltpu.MemorySpace.SMEM),     # gamma scalar
            ],
            out_specs=pl.BlockSpec((None, C, tq), lambda b, qi: (b, 0, qi)),
            scratch_shapes=[
                pltpu.VMEM((C8p, N), jnp.bfloat16),   # Q
                pltpu.VMEM((N, C8p), jnp.bfloat16),   # K^T
                pltpu.VMEM((C, N), jnp.bfloat16),     # V
            ],
        ),
        compiler_params=pltpu.CompilerParams(
            dimension_semantics=("parallel", "arbitrary"),
            vmem_limit_bytes=vmem_limit),
        cost_estimate=cost,
    )(x3, w_qkv, b_qkv, gamma)

    return out.reshape(B, C, H, W)


def init_params(key, input_nc):
    """PyTorch-style init for the 1x1 convs (U[-1/sqrt(fan_in), 1/sqrt(fan_in)]),
    gamma ~ N(0, 1) as in nn.Parameter(torch.randn(1))."""
    output_nc = max(input_nc // 8, 1)
    ks = jax.random.split(key, 7)

    def conv1x1_init(kw, kb, out_c, in_c):
        lim = 1.0 / float(in_c) ** 0.5
        w = jax.random.uniform(kw, (out_c, in_c), jnp.float32, -lim, lim)
        b = jax.random.uniform(kb, (out_c, 1), jnp.float32, -lim, lim)
        return w, b

    wq, bq = conv1x1_init(ks[0], ks[1], output_nc, input_nc)
    wk, bk = conv1x1_init(ks[2], ks[3], output_nc, input_nc)
    wv, bv = conv1x1_init(ks[4], ks[5], input_nc, input_nc)
    gamma = jax.random.normal(ks[6], (1, 1), jnp.float32)
    return (wq, bq, wk, bk, wv, bv, gamma)


def reference(x, params):
    """Pure-JAX f32 reference matching the PyTorch forward."""
    wq, bq, wk, bk, wv, bv, gamma = params
    B, C, H, W = x.shape
    N = H * W
    hp = jax.lax.Precision.HIGHEST
    xf = x.reshape(B, C, N).astype(jnp.float32)
    q = jnp.einsum('oc,bcn->bon', wq, xf, precision=hp) + bq[None]
    k = jnp.einsum('oc,bcn->bon', wk, xf, precision=hp) + bk[None]
    v = jnp.einsum('oc,bcn->bon', wv, xf, precision=hp) + bv[None]
    energy = jnp.einsum('bci,bcj->bij', q, k, precision=hp)          # [B, N, N]
    attn = jax.nn.softmax(energy, axis=-1)
    out = jnp.einsum('bcj,bij->bci', v, attn, precision=hp)          # [B, C, N]
    return (gamma[0, 0] * out + xf).reshape(B, C, H, W)


if __name__ == "__main__":
    # Small shapes consistent with the module: B=2, C=32 (so C8 = 4), 16x16 spatial.
    B, C, H, W = 2, 32, 16, 16

    key = jax.random.PRNGKey(0)
    kx, kp = jax.random.split(key)
    x = jax.random.normal(kx, (B, C, H, W), jnp.float32)
    params = init_params(kp, C)

    out = jax.block_until_ready(self_attention(x, params))
    ref = reference(x, params)

    assert out.shape == (B, C, H, W)
    # bf16 MXU inputs with f32 accumulation -> compare at a bf16-appropriate tolerance.
    assert jnp.allclose(out, ref, rtol=1e-2, atol=1e-2), "mismatch vs. reference"

    print("KERNEL_OK")
</pallas_src>

<mosaic_0001>
module attributes {stable_mosaic.version = 11 : i64} {
  func.func @self_attention_kernel(%arg0: i32, %arg1: i32, %arg2: memref<1x32x256xf32, #tpu.memory_space<vmem>>, %arg3: memref<48x32xbf16, #tpu.memory_space<vmem>>, %arg4: memref<48x1xf32, #tpu.memory_space<vmem>>, %arg5: memref<1x1xf32, #tpu.memory_space<smem>>, %arg6: memref<1x32x256xf32, #tpu.memory_space<vmem>>, %arg7: memref<8x256xbf16, #tpu.memory_space<vmem>>, %arg8: memref<256x8xbf16, #tpu.memory_space<vmem>>, %arg9: memref<32x256xbf16, #tpu.memory_space<vmem>>) attributes {dimension_semantics = [#tpu.dimension_semantics<parallel>, #tpu.dimension_semantics<arbitrary>], iteration_bounds = array<i64: 2, 1>, scalar_prefetch = 0 : i64, scratch_operands = 3 : i64, tpu.core_type = #tpu.core_type<tc>, window_params = [{transform_indices = @transform_0, window_bounds = array<i64: 1, 32, 256>}, {pipeline_mode = #tpu.pipeline_mode<synchronous>, transform_indices = @transform_1, window_bounds = array<i64: 48, 32>}, {pipeline_mode = #tpu.pipeline_mode<synchronous>, transform_indices = @transform_2, window_bounds = array<i64: 48, 1>}, {transform_indices = @transform_3, window_bounds = array<i64: 1, 1>}, {transform_indices = @transform_4, window_bounds = array<i64: 1, 32, 256>}]} {
    %c0_i32 = arith.constant 0 : i32
    %0 = arith.cmpi eq, %arg1, %c0_i32 : i32
    %1 = arith.extui %0 : i1 to i32
    %c0_i32_0 = arith.constant 0 : i32
    %2 = arith.cmpi ne, %1, %c0_i32_0 : i32
    scf.if %2 {
      %c0_15 = arith.constant 0 : index
      %c0_16 = arith.constant 0 : index
      %c0_17 = arith.constant 0 : index
      %32 = vector.load %arg2[%c0_15, %c0_16, %c0_17] : memref<1x32x256xf32, #tpu.memory_space<vmem>>, vector<1x32x256xf32>
      %33 = vector.shape_cast %32 : vector<1x32x256xf32> to vector<32x256xf32>
      %34 = arith.truncf %33 : vector<32x256xf32> to vector<32x256xbf16>
      %c0_18 = arith.constant 0 : index
      %c0_19 = arith.constant 0 : index
      %35 = vector.load %arg3[%c0_18, %c0_19] : memref<48x32xbf16, #tpu.memory_space<vmem>>, vector<48x32xbf16>
      %cst_20 = arith.constant dense<0.000000e+00> : vector<48x256xf32>
      %36 = tpu.matmul %35, %34, %cst_20 {dimension_numbers = #tpu.dot_dimension_numbers<[1], [0], [0], [1], [0, 0, 1, 1], [], []>} : vector<48x32xbf16>, vector<32x256xbf16>, vector<48x256xf32> -> vector<48x256xf32>
      %c0_21 = arith.constant 0 : index
      %c0_22 = arith.constant 0 : index
      %37 = vector.load %arg4[%c0_21, %c0_22] : memref<48x1xf32, #tpu.memory_space<vmem>>, vector<48x1xf32>
      %38 = vector.broadcast %37 : vector<48x1xf32> to vector<48x256xf32>
      %39 = arith.addf %36, %38 : vector<48x256xf32>
      %40 = vector.extract_strided_slice %39 {offsets = [0, 0], sizes = [8, 256], strides = [1, 1]} : vector<48x256xf32> to vector<8x256xf32>
      %41 = arith.truncf %40 : vector<8x256xf32> to vector<8x256xbf16>
      %c0_23 = arith.constant 0 : index
      %c0_24 = arith.constant 0 : index
      %42 = vector.load %arg7[%c0_23, %c0_24] : memref<8x256xbf16, #tpu.memory_space<vmem>>, vector<8x256xbf16>
      tpu.vector_store %arg7[%c0_23, %c0_24], %41 {strides = array<i32>} : memref<8x256xbf16, #tpu.memory_space<vmem>>, vector<8x256xbf16>,
      %43 = vector.extract_strided_slice %39 {offsets = [8, 0], sizes = [8, 256], strides = [1, 1]} : vector<48x256xf32> to vector<8x256xf32>
      %44 = tpu.transpose %43, [1, 0] : vector<8x256xf32> -> vector<256x8xf32>
      %45 = arith.truncf %44 : vector<256x8xf32> to vector<256x8xbf16>
      %c0_25 = arith.constant 0 : index
      %c0_26 = arith.constant 0 : index
      %46 = vector.load %arg8[%c0_25, %c0_26] : memref<256x8xbf16, #tpu.memory_space<vmem>>, vector<256x8xbf16>
      tpu.vector_store %arg8[%c0_25, %c0_26], %45 {strides = array<i32>} : memref<256x8xbf16, #tpu.memory_space<vmem>>, vector<256x8xbf16>,
      %47 = vector.extract_strided_slice %39 {offsets = [16, 0], sizes = [32, 256], strides = [1, 1]} : vector<48x256xf32> to vector<32x256xf32>
      %48 = arith.truncf %47 : vector<32x256xf32> to vector<32x256xbf16>
      %c0_27 = arith.constant 0 : index
      %c0_28 = arith.constant 0 : index
      %49 = vector.load %arg9[%c0_27, %c0_28] : memref<32x256xbf16, #tpu.memory_space<vmem>>, vector<32x256xbf16>
      tpu.vector_store %arg9[%c0_27, %c0_28], %48 {strides = array<i32>} : memref<32x256xbf16, #tpu.memory_space<vmem>>, vector<32x256xbf16>,
    } else {
    }
    %c256_i32 = arith.constant 256 : i32
    %3 = arith.muli %arg1, %c256_i32 : i32
    %4 = tpu.assume_multiple %3, 256 : i32
    %c0 = arith.constant 0 : index
    %c0_1 = arith.constant 0 : index
    %5 = arith.index_cast %4 : i32 to index
    %6 = vector.load %arg2[%c0, %c0_1, %5] : memref<1x32x256xf32, #tpu.memory_space<vmem>>, vector<1x32x256xf32>
    %7 = vector.shape_cast %6 : vector<1x32x256xf32> to vector<32x256xf32>
    %c0_2 = arith.constant 0 : index
    %8 = arith.index_cast %4 : i32 to index
    %9 = vector.load %arg7[%c0_2, %8] : memref<8x256xbf16, #tpu.memory_space<vmem>>, vector<8x256xbf16>
    %c0_3 = arith.constant 0 : index
    %c0_4 = arith.constant 0 : index
    %10 = vector.load %arg8[%c0_3, %c0_4] : memref<256x8xbf16, #tpu.memory_space<vmem>>, vector<256x8xbf16>
    %cst = arith.constant dense<0.000000e+00> : vector<256x256xf32>
    %11 = tpu.matmul %10, %9, %cst {dimension_numbers = #tpu.dot_dimension_numbers<[1], [0], [0], [1], [0, 0, 1, 1], [], []>} : vector<256x8xbf16>, vector<8x256xbf16>, vector<256x256xf32> -> vector<256x256xf32>
    %cst_5 = arith.constant dense<0xFF800000> : vector<256xf32>
    %12 = vector.multi_reduction <maximumf>, %11, %cst_5 [0] : vector<256x256xf32> to vector<256xf32>
    %13 = vector.shape_cast %12 : vector<256xf32> to vector<1x256xf32>
    %14 = vector.broadcast %13 : vector<1x256xf32> to vector<256x256xf32>
    %15 = arith.subf %11, %14 : vector<256x256xf32>
    %16 = math.exp %15 : vector<256x256xf32>
    %cst_6 = arith.constant dense<0.000000e+00> : vector<256xf32>
    %17 = vector.multi_reduction <add>, %16, %cst_6 [0] : vector<256x256xf32> to vector<256xf32>
    %18 = vector.shape_cast %17 : vector<256xf32> to vector<1x256xf32>
    %c0_7 = arith.constant 0 : index
    %c0_8 = arith.constant 0 : index
    %19 = vector.load %arg9[%c0_7, %c0_8] : memref<32x256xbf16, #tpu.memory_space<vmem>>, vector<32x256xbf16>
    %20 = arith.truncf %16 : vector<256x256xf32> to vector<256x256xbf16>
    %cst_9 = arith.constant dense<0.000000e+00> : vector<32x256xf32>
    %21 = tpu.matmul %19, %20, %cst_9 {dimension_numbers = #tpu.dot_dimension_numbers<[1], [0], [0], [1], [0, 0, 1, 1], [], []>} : vector<32x256xbf16>, vector<256x256xbf16>, vector<32x256xf32> -> vector<32x256xf32>
    %c0_10 = arith.constant 0 : index
    %c0_11 = arith.constant 0 : index
    %22 = memref.load %arg5[%c0_10, %c0_11] : memref<1x1xf32, #tpu.memory_space<smem>>
    %23 = tpu.reciprocal %18 {approx = true} : vector<1x256xf32> -> vector<1x256xf32>
    %24 = vector.broadcast %22 : f32 to vector<1x256xf32>
    %25 = arith.mulf %24, %23 : vector<1x256xf32>
    %26 = vector.broadcast %25 : vector<1x256xf32> to vector<32x256xf32>
    %27 = arith.mulf %21, %26 : vector<32x256xf32>
    %28 = arith.addf %27, %7 : vector<32x256xf32>
    %c0_12 = arith.constant 0 : index
    %c0_13 = arith.constant 0 : index
    %c0_14 = arith.constant 0 : index
    %29 = vector.load %arg6[%c0_12, %c0_13, %c0_14] : memref<1x32x256xf32, #tpu.memory_space<vmem>>, vector<1x32x256xf32>
    %30 = vector.shape_cast %29 : vector<1x32x256xf32> to vector<32x256xf32>
    %31 = vector.shape_cast %28 : vector<32x256xf32> to vector<1x32x256xf32>
    tpu.vector_store %arg6[%c0_12, %c0_13, %c0_14], %31 {strides = array<i32>} : memref<1x32x256xf32, #tpu.memory_space<vmem>>, vector<1x32x256xf32>,
    return
  }
  func.func @transform_0(%arg0: i32, %arg1: i32) -> (i32, i32, i32) {
    %c0_i32 = arith.constant 0 : i32
    %c0_i32_0 = arith.constant 0 : i32
    %c0_i32_1 = arith.constant 0 : i32
    return %arg0, %c0_i32, %c0_i32_0 : i32, i32, i32
  }
  func.func @transform_1(%arg0: i32, %arg1: i32) -> (i32, i32) {
    %c0_i32 = arith.constant 0 : i32
    %c0_i32_0 = arith.constant 0 : i32
    %c0_i32_1 = arith.constant 0 : i32
    return %c0_i32, %c0_i32_0 : i32, i32
  }
  func.func @transform_2(%arg0: i32, %arg1: i32) -> (i32, i32) {
    %c0_i32 = arith.constant 0 : i32
    %c0_i32_0 = arith.constant 0 : i32
    %c0_i32_1 = arith.constant 0 : i32
    return %c0_i32, %c0_i32_0 : i32, i32
  }
  func.func @transform_3(%arg0: i32, %arg1: i32) -> (i32, i32) {
    %c0_i32 = arith.constant 0 : i32
    %c0_i32_0 = arith.constant 0 : i32
    %c0_i32_1 = arith.constant 0 : i32
    return %c0_i32, %c0_i32_0 : i32, i32
  }
  func.func @transform_4(%arg0: i32, %arg1: i32) -> (i32, i32, i32) {
    %c0_i32 = arith.constant 0 : i32
    %c0_i32_0 = arith.constant 0 : i32
    return %arg0, %c0_i32, %arg1 : i32, i32, i32
  }
}

</mosaic_0001>

<bundles_post_ra>
// kernel: tpu_custom_call.1
= control target key start
LH: loop header
LB: loop body
LE: loop exit
PB: predicated region body
PF: predicated region fallthrough
CT: control target
= control target key end

     0   :  { %s2927_s0 = inlined_call_operand.hbm [shape: f32[2,32,256], index: 0, kind: input, shape index: {}]   ;;  %s2928_s1 = inlined_call_operand.vmem [shape: bf16[48,32], index: 1, kind: input, shape index: {}]   ;;  %s2929_s2 = inlined_call_operand.vmem [shape: f32[48,1], index: 2, kind: input, shape index: {}]   ;;  %s2930_s3 = inlined_call_operand.<no memory space> [shape: f32[1,1], index: 3, kind: input, shape index: {}]   ;;  %s2931_s4 = inlined_call_operand.hbm [shape: f32[2,32,256], index: 4, kind: output, shape index: {}]  }
   0x1   :  { %9 = sst [smem:[#allocation5]] %s2930_s3 }
   0x2   :  { %10 = vsyncpa [#allocation7], 0 }
   0x3   :  { %12 = vsyncpa [#allocation7 + $0x1], 0 }
   0x4   :  { %13 = vsyncpa [#allocation8], 0 }
   0x5   :  { %15 = vsyncpa [#allocation8 + $0x1], 0  ;;  %s2113_s17 = smov 0   ;;  %s2115_s18 = smov 0  }
   0x6   :  { %s2117_s19 = smov 0   ;;  %s2119_s20 = smov 0  }
   0x7   :  { %s2121_s21 = smov 0   ;;  %s2123_s22 = smov 0  }
   0x8 LB: > { %s1606_s3 = sadd.s32 4294967295, %s2076_s22   ;;  %s1607_s23 = sadd.s32 4294967294, %s2076_s22   ;;  %s2076_s22 = sphi %s2123_s22, %s21_s22   ;;  %s2072_s21 = sphi %s2121_s21, %s3015_s21   ;;  %s2068_s20 = sphi %s2119_s20, %s3014_s20   ;;  %s2064_s19 = sphi %s2117_s19, %s3013_s19   ;;  %s2060_s18 = sphi %s2115_s18, %s3012_s18   ;;  %s2056_s17 = sphi %s2113_s17, %s3011_s17  }
   0x9   : > { %s33_s24 = sadd.s32 1, %s2072_s21  ;;  %s40_s25 = sadd.s32 1, %s2064_s19 }
   0xa   : > { %p35_p0 = scmp.ge.s32.totalorder %s33_s24, 2  ;;  %p47_p1 = scmp.ne.s32.totalorder %s2064_s19, %s2060_s18 }
   0xb   : > { %p48_p2 = scmp.eq.s32.totalorder %s2076_s22, 0  ;;  %p53_p3 = scmp.ne.s32.totalorder %s2060_s18, %s2056_s17 }
   0xc   : > { %s3017_s24 = smov (%p35_p0, %s33_s24), 0  ;;  %p54_p5 = scmp.eq.s32.totalorder %s1606_s3, 0 }
   0xd   : > { %p2154_p4 = por %p48_p2, %p47_p1  ;;  %s37_s27 = ssub.s32 %s2072_s21, %s3017_s24 }
   0xe   : > { %p142_p6 = scmp.eq.s32.totalorder %s1606_s3, 1  ;;  %p38_p7 = scmp.eq.s32.totalorder %s37_s27, 0 }
   0xf   : > { %p2160_p8 = por %p54_p5, %p53_p3  ;;  %p148_p10 = scmp.eq.s32.totalorder %s1607_s23, 1 }
  0x10   : > { %p2164_p9 = por %p142_p6, %p47_p1  ;;  %p1760_p13 = scmp.lt.s32.totalorder %s2076_s22, 2 }
  0x11   : > { %s2169_s30 = scalar_select %p38_p7, %s2064_s19, %s40_s25  }
  0x12   : > { %p2171_p11 = por %p148_p10, %p53_p3  ;;  %s177_s6 = sand.u32 1, %s2064_s19  }
  0x13   : > { %s1610_s7 = sshll.u32 %s177_s6, 6  ;;  %s1703_s8 = sshll.u32 %s2072_s21, 10 }
  0x14   : > { %s187_s11 = scalar_lea.hbm %s2927_s0, %s1703_s8  ;;  %s181_s12 = scalar_lea.vmem [#allocation6], %s1610_s7 }
  0x15   : > { %s188_s13 = sshll.u32 %s181_s12, 4  ;;  %p2184_p0 = pnand %p1760_p13, %p2154_p4  ;;  %s189_s13 = int_to_ptr.vmem [resolvable:$true] %s188_s13 }
  0x16   : > { %p1613_p1 = scmp.ge.s32.totalorder %s2076_s22, 1  ;;  %s178_s15 = scalar_lea.sflag [#allocation7], %s177_s6 }
  0x17   : > { %p1970_p2 = pneg %p2184_p0  ;;  %s1981_s16 = scalar_lea.vmem %s189_s13, 1024 }
  0x18   : > { %p1982_p3 = scmp.ne.s32.totalorder %s189_s13, %s1981_s16  ;;  %s2078_s3 = smov [#allocation6]  }
  0x19   : > { %s1986_s23 = sshll.u32 %s2078_s3, 4  ;;  %s1987_s23 = int_to_ptr.vmem [resolvable:$false] %s1986_s23 }
  0x1a   : > { %p1984_p5 = pnand %p1982_p3, %p1970_p2  ;;  %s1988_s25 = scalar_lea.vmem %s1987_s23, 2048 }
  0x1b   : > { %p1989_p7 = scmp.lt.s32.totalorder %s189_s13, %s1987_s23  ;;  %p1990_p10 = scmp.lt.s32.totalorder %s1988_s25, %s1981_s16 }
  0x1c   : > { %p1985_p6 = pneg %p1984_p5 }
  0x1d   : > { %p1991_p12 = por %p1990_p10, %p1989_p7 }
  0x1f   : > { %p1992_p4 = pnand %p1991_p12, %p1985_p6 }
  0x21   : > { %1995 = shalt.err (!%p1992_p4)
}
  0x22   : > { %s2079_s26 = smov 256   ;;  %s2080_s27 = smov 16  }
  0x23   : > { %1755 = dma.hbm_to_vmem [thread:$0]  (!%p2184_p0), %s187_s11, 1024, %s189_s13, %s178_s15, %s2079_s26, %s2079_s26, %s2080_s27  }
  0x24   : > { %p196_p13 = scmp.lt.s32.totalorder %s2076_s22, 3 }
  0x26   : > { %p197_p2 = pnand %p1613_p1, %p196_p13 }
  0x28   : > { %200 = sbr.rel (%p197_p2) target bundleno = 1084 (0x43c), region = 36 }
  0x2d   : > { %s2197_s6 = sand.u32 1, %s2060_s18  }
  0x2e   : > { %s1614_s7 = sshll.u32 %s2197_s6, 6  ;;  %s203_s8 = scalar_lea.sflag [#allocation7], %s2197_s6 }
  0x2f   : > { %s2203_s9 = scalar_lea.vmem [#allocation6], %s1614_s7 }
  0x30   : > { %2047 = dma.done.wait (%p2160_p8), %s203_s8, 1024  }
  0x31   : > { %2049 = vsyncadd (%p2160_p8), %s203_s8, 4294966272  ;;  %v2081_v0 = vmov 0   ;;  %v242_v1 = vld [vmem:[%s2203_s9 + $0x28] sm:$0xff]  ;;  %v244_v2 = vld [vmem:[%s2203_s9 + $0x38] sm:$0xff]  ;;  %vm306_vm0 = vcmask 261120   ;;  %vm823_vm1 = vcmask 1043456  }
  0x32   : > { %348 = vmatprep.mubr.bf16.mxu0 %v2081_v0  ;;  %1816 = vset.pattern.permute.xlu0 %v2081_v0  ;;  %v241_v3 = vld [vmem:[%s2203_s9 + $0x20] sm:$0xff]  ;;  %v248_v4 = vpack.c.bf16 %v244_v2, %v242_v1  ;;  %v243_v5 = vld [vmem:[%s2203_s9 + $0x30] sm:$0xff]  ;;  %v238_v6 = vld [vmem:[%s2203_s9 + $0x8] sm:$0xff]  ;;  %vm580_vm2 = vcmask 60416   ;;  %vm774_vm3 = vcmask 64512   ;;  %s1472_s13 = sld [smem:[#allocation5]] }
  0x33   : > { %862 = vmatprep.mubr.bf16.mxu1 %v2081_v0  ;;  %v240_v7 = vld [vmem:[%s2203_s9 + $0x18] sm:$0xff]  ;;  %v247_v8 = vpack.c.bf16 %v243_v5, %v241_v3  ;;  %v237_v10 = vld [vmem:[%s2203_s9] sm:$0xff]  ;;  %v239_v11 = vld [vmem:[%s2203_s9 + $0x10] sm:$0xff]  ;;  %s2857_s14 = scalar_lea.vmem [#allocation9], %s1614_s7  ;;  %s1741_s15 = sshll.u32 %s2068_s20, 10 }
  0x34   : > { %v246_v9 = vpack.c.bf16 %v240_v7, %v238_v6  ;;  %328 = vmatprep.subr.bf16.mxu0 %v248_v4  ;;  %v245_v12 = vpack.c.bf16 %v239_v11, %v237_v10  ;;  %v256_v13 = vld [vmem:[%s2929_s2 + $0x8] sm:$0xff]  ;;  %v1817_v14 = vld [vmem:[%s2928_s1] sm:$0xff]   ;;  %v257_v16 = vld [vmem:[%s2929_s2 + $0x10] sm:$0xff]  ;;  %s1518_s7 = sshll.u32 %s2857_s14, 4  ;;  %s2877_s23 = scalar_lea.hbm %s2931_s4, %s1741_s15  ;;  %s2871_s7 = int_to_ptr.vmem [resolvable:$true] %s1518_s7 }
  0x35   : > { %329 = vmatpush1.bf16.msra.mxu0 %v247_v8  ;;  %268 = vperm.xlu0 %1816, %v256_v13   ;;  %v255_v15 = vld [vmem:[%s2929_s2] sm:$0xff]  ;;  %v1818_v17 = vld [vmem:[%s2928_s1 + $0x8] sm:$0xff]   ;;  %v258_v18 = vld [vmem:[%s2929_s2 + $0x18] sm:$0xff]  ;;  %s1503_s25 = scalar_lea.sflag [#allocation8], %s2197_s6  ;;  %s1996_s20 = scalar_lea.vmem %s2871_s7, 1024 }
  0x36   : > { %330 = vmatprep.subr.bf16.mxu0 %v246_v9  ;;  %v259_v19 = vld [vmem:[%s2929_s2 + $0x20] sm:$0xff]  ;;  %v1819_v20 = vld [vmem:[%s2928_s1 + $0x10] sm:$0xff]   ;;  %v260_v21 = vld [vmem:[%s2929_s2 + $0x28] sm:$0xff]  ;;  %p1997_p8 = scmp.ne.s32.totalorder %s2871_s7, %s1996_s20 }
  0x38   : > { %p1998_p12 = pnand %p1997_p8, %p2164_p9 }
  0x39   : > { %331 = vmatpush1.bf16.msra.mxu0 %v245_v12  ;;  %263 = vperm.xlu0 %1816, %v255_v15  }
  0x3a   : > { %p1999_p0 = pneg %p1998_p12 }
  0x3c   : > { %1619 = vmatmul.mubr.msk.bf16.vlgmr.msra.gmra.mxu0 %vm306_vm0, %v1817_v14 }
  0x3d   : > { %358 = vmatprep.mubr.bf16.mxu0 %v2081_v0  ;;  %273 = vperm.xlu0 %1816, %v257_v16  }
  0x41   : > { %278 = vperm.xlu0 %1816, %v258_v18  }
  0x44   : > { %1620 = vmatmul.mubr.msk.bf16.gmra.mxu0 %vm306_vm0, %v1818_v17 }
  0x45   : > { %368 = vmatprep.mubr.bf16.mxu0 %v2081_v0  ;;  %283 = vperm.xlu0 %1816, %v259_v19  }
  0x49   : > { %288 = vperm.xlu0 %1816, %v260_v21  }
  0x4c   : > { %1621 = vmatmul.mubr.msk.bf16.gmra.mxu0 %vm306_vm0, %v1819_v20 }
  0xb0   : > { %v269_v22 = vpop.permute.xlu0 %268 }
  0xb4   : > { %v264_v23 = vpop.permute.xlu0 %263 }
  0xb8   : > { %v274_v32 = vpop.permute.xlu0 %273 }
  0xbc   : > { %v279_v37 = vpop.permute.xlu0 %278 }
  0xfc   : > { %v350_v24 = vpop.f32.mrf.mxu0 }
  0xfd   : > { %v351_v25 = vadd.f32 %v350_v24, %v264_v23 }
  0xfe   : > { %v352_v26 = vpop.f32.mrf.mxu0 }
  0xff   : > { %v1742_v27 = vpack.c.bf16 %v351_v25, %v351_v25  ;;  %v353_v28 = vadd.f32 %v352_v26, %v264_v23 }
 0x100   : > { %v354_v29 = vpop.f32.mrf.mxu0 }
 0x101   : > { %v1743_v30 = vpack.c.bf16 %v353_v28, %v353_v28  ;;  %v355_v31 = vadd.f32 %v354_v29, %v269_v22  ;;  %v825_v34 = vsel %vm823_vm1, %v1742_v27, 0 }
 0x102   : > { %v356_v33 = vpop.f32.mrf.mxu0 }
 0x103   : > { %388 = vxpose.xlu1.b32.start.end [1/1] (short) %v355_v31, 128  ;;  %1677 = vmatprep.subr.msk.bf16.mxu1 %vm823_vm1, %v1743_v30  ;;  %v357_v46 = vadd.f32 %v356_v33, %v269_v22 }
 0x104   : > { %v360_v35 = vpop.f32.mrf.mxu0  ;;  %845 = vmatpush1.bf16.msra.mxu1 %v825_v34 }
 0x105   : > { %v2252_v39 = vadd.f32 %v360_v35, %v274_v32 }
 0x106   : > { %v362_v36 = vpop.f32.mrf.mxu0 }
 0x107   : > { %2960 = vst [vmem:[#allocation12_spill] sm:$0xff] %v2252_v39  ;;  %v363_v42 = vadd.f32 %v362_v36, %v274_v32 }
 0x108   : > { %v364_v38 = vpop.f32.mrf.mxu0 }
 0x109   : > { %v2254_v40 = vadd.f32 %v364_v38, %v279_v37 }
 0x10a   : > { %v366_v41 = vpop.f32.mrf.mxu0 }
 0x10b   : > { %2961 = vst [vmem:[#allocation13_spill] sm:$0xff] %v2254_v40  ;;  %v367_v44 = vadd.f32 %v366_v41, %v279_v37 }
 0x10d   : > { %v1745_v45 = vpack.c.bf16 %v367_v44, %v363_v42 }
 0x10f   : > { %1451 = vmatprep.mubr.bf16.mxu0 %v1745_v45 }
 0x140   : > { %420 = vxpose.xlu1.b32.start.end [1/1] (short) %v357_v46, 128 }
 0x17f   : > { %v404_v47 = vpop.trf.xlu1 }
 0x180   : > { %v1705_v48 = vpack.c.bf16 %v404_v47, %v404_v47 }
 0x182   : > { %581 = vst.msk [vmem:[#allocation3] sm:$0xf] %vm580_vm2, %v1705_v48 }
 0x183   : > { %v405_v49 = vpop.trf.xlu1 }
 0x184   : > { %v1706_v50 = vpack.c.bf16 %v405_v49, %v405_v49 }
 0x186   : > { %582 = vst.msk [vmem:[#allocation3 + $0x4] sm:$0xf] %vm580_vm2, %v1706_v50 }
 0x187   : > { %v406_v51 = vpop.trf.xlu1 }
 0x188   : > { %v1707_v52 = vpack.c.bf16 %v406_v51, %v406_v51 }
 0x18a   : > { %583 = vst.msk [vmem:[#allocation3 + $0x8] sm:$0xf] %vm580_vm2, %v1707_v52 }
 0x18b   : > { %v407_v53 = vpop.trf.xlu1 }
 0x18c   : > { %v1708_v54 = vpack.c.bf16 %v407_v53, %v407_v53 }
 0x18d   : > { %v1820_v55 = vld [vmem:[#allocation3] sm:$0xff]  }
 0x18e   : > { %584 = vst.msk [vmem:[#allocation3 + $0xc] sm:$0xf] %vm580_vm2, %v1708_v54  ;;  %1678 = vmatmul.mubr.msk.bf16.vlgmr.msra.gmra.mxu1 %vm774_vm3, %v1820_v55 }
 0x18f   : > { %v408_v56 = vpop.trf.xlu1  ;;  %872 = vmatprep.mubr.bf16.mxu1 %v2081_v0 }
 0x190   : > { %v1709_v57 = vpack.c.bf16 %v408_v56, %v408_v56 }
 0x192   : > { %585 = vst.msk [vmem:[#allocation3 + $0x10] sm:$0xf] %vm580_vm2, %v1709_v57 }
 0x193   : > { %v409_v58 = vpop.trf.xlu1 }
 0x194   : > { %v1710_v59 = vpack.c.bf16 %v409_v58, %v409_v58 }
 0x195   : > { %v1821_v60 = vld [vmem:[#allocation3 + $0x8] sm:$0xff]  }
 0x196   : > { %586 = vst.msk [vmem:[#allocation3 + $0x14] sm:$0xf] %vm580_vm2, %v1710_v59  ;;  %1679 = vmatmul.mubr.msk.bf16.gmra.mxu1 %vm774_vm3, %v1821_v60 }
 0x197   : > { %v410_v61 = vpop.trf.xlu1  ;;  %882 = vmatprep.mubr.bf16.mxu1 %v2081_v0 }
 0x198   : > { %v1711_v62 = vpack.c.bf16 %v410_v61, %v410_v61 }
 0x19a   : > { %587 = vst.msk [vmem:[#allocation3 + $0x18] sm:$0xf] %vm580_vm2, %v1711_v62 }
 0x19b   : > { %v411_v63 = vpop.trf.xlu1 }
 0x19c   : > { %v1712_v1 = vpack.c.bf16 %v411_v63, %v411_v63 }
 0x19d   : > { %v1822_v2 = vld [vmem:[#allocation3 + $0x10] sm:$0xff]  }
 0x19e   : > { %588 = vst.msk [vmem:[#allocation3 + $0x1c] sm:$0xf] %vm580_vm2, %v1712_v1  ;;  %1680 = vmatmul.mubr.msk.bf16.gmra.mxu1 %vm774_vm3, %v1822_v2 }
 0x19f   : > { %v412_v3 = vpop.trf.xlu1  ;;  %892 = vmatprep.mubr.bf16.mxu1 %v2081_v0 }
 0x1a0   : > { %v1713_v4 = vpack.c.bf16 %v412_v3, %v412_v3 }
 0x1a2   : > { %589 = vst.msk [vmem:[#allocation3 + $0x20] sm:$0xf] %vm580_vm2, %v1713_v4 }
 0x1a3   : > { %v413_v5 = vpop.trf.xlu1 }
 0x1a4   : > { %v1714_v6 = vpack.c.bf16 %v413_v5, %v413_v5 }
 0x1a5   : > { %v1823_v7 = vld [vmem:[#allocation3 + $0x18] sm:$0xff]  }
 0x1a6   : > { %590 = vst.msk [vmem:[#allocation3 + $0x24] sm:$0xf] %vm580_vm2, %v1714_v6  ;;  %1681 = vmatmul.mubr.msk.bf16.gmra.mxu1 %vm774_vm3, %v1823_v7 }
 0x1a7   : > { %v414_v8 = vpop.trf.xlu1  ;;  %902 = vmatprep.mubr.bf16.mxu1 %v2081_v0 }
 0x1a8   : > { %v1715_v9 = vpack.c.bf16 %v414_v8, %v414_v8 }
 0x1aa   : > { %591 = vst.msk [vmem:[#allocation3 + $0x28] sm:$0xf] %vm580_vm2, %v1715_v9 }
 0x1ab   : > { %v415_v10 = vpop.trf.xlu1 }
 0x1ac   : > { %v1716_v11 = vpack.c.bf16 %v415_v10, %v415_v10 }
 0x1ad   : > { %v1824_v12 = vld [vmem:[#allocation3 + $0x20] sm:$0xff]  }
 0x1ae   : > { %592 = vst.msk [vmem:[#allocation3 + $0x2c] sm:$0xf] %vm580_vm2, %v1716_v11  ;;  %1682 = vmatmul.mubr.msk.bf16.gmra.mxu1 %vm774_vm3, %v1824_v12 }
 0x1af   : > { %v416_v13 = vpop.trf.xlu1  ;;  %912 = vmatprep.mubr.bf16.mxu1 %v2081_v0 }
 0x1b0   : > { %v1717_v14 = vpack.c.bf16 %v416_v13, %v416_v13 }
 0x1b2   : > { %593 = vst.msk [vmem:[#allocation3 + $0x30] sm:$0xf] %vm580_vm2, %v1717_v14 }
 0x1b3   : > { %v417_v15 = vpop.trf.xlu1 }
 0x1b4   : > { %v1718_v16 = vpack.c.bf16 %v417_v15, %v417_v15 }
 0x1b5   : > { %v1825_v17 = vld [vmem:[#allocation3 + $0x28] sm:$0xff]  }
 0x1b6   : > { %594 = vst.msk [vmem:[#allocation3 + $0x34] sm:$0xf] %vm580_vm2, %v1718_v16  ;;  %1683 = vmatmul.mubr.msk.bf16.gmra.mxu1 %vm774_vm3, %v1825_v17 }
 0x1b7   : > { %v418_v18 = vpop.trf.xlu1  ;;  %922 = vmatprep.mubr.bf16.mxu1 %v2081_v0 }
 0x1b8   : > { %v1719_v19 = vpack.c.bf16 %v418_v18, %v418_v18 }
 0x1ba   : > { %595 = vst.msk [vmem:[#allocation3 + $0x38] sm:$0xf] %vm580_vm2, %v1719_v19 }
 0x1bb   : > { %v419_v20 = vpop.trf.xlu1 }
 0x1bc   : > { %v1720_v21 = vpack.c.bf16 %v419_v20, %v419_v20 }
 0x1bd   : > { %v1826_v22 = vld [vmem:[#allocation3 + $0x30] sm:$0xff]  }
 0x1be   : > { %596 = vst.msk [vmem:[#allocation3 + $0x3c] sm:$0xf] %vm580_vm2, %v1720_v21  ;;  %1684 = vmatmul.mubr.msk.bf16.gmra.mxu1 %vm774_vm3, %v1826_v22 }
 0x1bf   : > { %v436_v23 = vpop.trf.xlu1  ;;  %932 = vmatprep.mubr.bf16.mxu1 %v2081_v0 }
 0x1c0   : > { %v1721_v24 = vpack.c.bf16 %v436_v23, %v436_v23 }
 0x1c2   : > { %597 = vst.msk [vmem:[#allocation3 + $0x40] sm:$0xf] %vm580_vm2, %v1721_v24 }
 0x1c3   : > { %v437_v25 = vpop.trf.xlu1 }
 0x1c4   : > { %v1722_v26 = vpack.c.bf16 %v437_v25, %v437_v25 }
 0x1c5   : > { %v1827_v27 = vld [vmem:[#allocation3 + $0x38] sm:$0xff]  }
 0x1c6   : > { %598 = vst.msk [vmem:[#allocation3 + $0x44] sm:$0xf] %vm580_vm2, %v1722_v26  ;;  %1685 = vmatmul.mubr.msk.bf16.gmra.mxu1 %vm774_vm3, %v1827_v27 }
 0x1c7   : > { %v438_v28 = vpop.trf.xlu1  ;;  %942 = vmatprep.mubr.bf16.mxu1 %v2081_v0 }
 0x1c8   : > { %v1723_v29 = vpack.c.bf16 %v438_v28, %v438_v28 }
 0x1ca   : > { %599 = vst.msk [vmem:[#allocation3 + $0x48] sm:$0xf] %vm580_vm2, %v1723_v29 }
 0x1cb   : > { %v439_v30 = vpop.trf.xlu1 }
 0x1cc   : > { %v1724_v31 = vpack.c.bf16 %v439_v30, %v439_v30 }
 0x1cd   : > { %v1828_v32 = vld [vmem:[#allocation3 + $0x40] sm:$0xff]  }
 0x1ce   : > { %600 = vst.msk [vmem:[#allocation3 + $0x4c] sm:$0xf] %vm580_vm2, %v1724_v31  ;;  %1686 = vmatmul.mubr.msk.bf16.gmra.mxu1 %vm774_vm3, %v1828_v32 }
 0x1cf   : > { %v440_v33 = vpop.trf.xlu1  ;;  %952 = vmatprep.mubr.bf16.mxu1 %v2081_v0 }
 0x1d0   : > { %v1725_v34 = vpack.c.bf16 %v440_v33, %v440_v33 }
 0x1d2   : > { %601 = vst.msk [vmem:[#allocation3 + $0x50] sm:$0xf] %vm580_vm2, %v1725_v34 }
 0x1d3   : > { %v441_v35 = vpop.trf.xlu1 }
 0x1d4   : > { %v1726_v36 = vpack.c.bf16 %v441_v35, %v441_v35 }
 0x1d5   : > { %v1829_v37 = vld [vmem:[#allocation3 + $0x48] sm:$0xff]  }
 0x1d6   : > { %602 = vst.msk [vmem:[#allocation3 + $0x54] sm:$0xf] %vm580_vm2, %v1726_v36  ;;  %1687 = vmatmul.mubr.msk.bf16.gmra.mxu1 %vm774_vm3, %v1829_v37 }
 0x1d7   : > { %v442_v38 = vpop.trf.xlu1  ;;  %962 = vmatprep.mubr.bf16.mxu1 %v2081_v0 }
 0x1d8   : > { %v1727_v41 = vpack.c.bf16 %v442_v38, %v442_v38 }
 0x1da   : > { %603 = vst.msk [vmem:[#allocation3 + $0x58] sm:$0xf] %vm580_vm2, %v1727_v41 }
 0x1db   : > { %v443_v42 = vpop.trf.xlu1 }
 0x1dc   : > { %v1728_v44 = vpack.c.bf16 %v443_v42, %v443_v42 }
 0x1dd   : > { %v1830_v45 = vld [vmem:[#allocation3 + $0x50] sm:$0xff]  }
 0x1de   : > { %604 = vst.msk [vmem:[#allocation3 + $0x5c] sm:$0xf] %vm580_vm2, %v1728_v44  ;;  %1688 = vmatmul.mubr.msk.bf16.gmra.mxu1 %vm774_vm3, %v1830_v45 }
 0x1df   : > { %v444_v46 = vpop.trf.xlu1  ;;  %972 = vmatprep.mubr.bf16.mxu1 %v2081_v0 }
 0x1e0   : > { %v1729_v47 = vpack.c.bf16 %v444_v46, %v444_v46 }
 0x1e2   : > { %605 = vst.msk [vmem:[#allocation3 + $0x60] sm:$0xf] %vm580_vm2, %v1729_v47 }
 0x1e3   : > { %v445_v48 = vpop.trf.xlu1 }
 0x1e4   : > { %v1730_v49 = vpack.c.bf16 %v445_v48, %v445_v48 }
 0x1e5   : > { %v1831_v50 = vld [vmem:[#allocation3 + $0x58] sm:$0xff]  }
 0x1e6   : > { %606 = vst.msk [vmem:[#allocation3 + $0x64] sm:$0xf] %vm580_vm2, %v1730_v49  ;;  %1689 = vmatmul.mubr.msk.bf16.gmra.mxu1 %vm774_vm3, %v1831_v50 }
 0x1e7   : > { %v446_v51 = vpop.trf.xlu1  ;;  %982 = vmatprep.mubr.bf16.mxu1 %v2081_v0 }
 0x1e8   : > { %v1731_v52 = vpack.c.bf16 %v446_v51, %v446_v51 }
 0x1ea   : > { %607 = vst.msk [vmem:[#allocation3 + $0x68] sm:$0xf] %vm580_vm2, %v1731_v52 }
 0x1eb   : > { %v447_v53 = vpop.trf.xlu1 }
 0x1ec   : > { %v1732_v54 = vpack.c.bf16 %v447_v53, %v447_v53 }
 0x1ed   : > { %v1832_v55 = vld [vmem:[#allocation3 + $0x60] sm:$0xff]  }
 0x1ee   : > { %608 = vst.msk [vmem:[#allocation3 + $0x6c] sm:$0xf] %vm580_vm2, %v1732_v54  ;;  %1690 = vmatmul.mubr.msk.bf16.gmra.mxu1 %vm774_vm3, %v1832_v55 }
 0x1ef   : > { %v448_v56 = vpop.trf.xlu1  ;;  %992 = vmatprep.mubr.bf16.mxu1 %v2081_v0 }
 0x1f0   : > { %v1733_v57 = vpack.c.bf16 %v448_v56, %v448_v56 }
 0x1f2   : > { %609 = vst.msk [vmem:[#allocation3 + $0x70] sm:$0xf] %vm580_vm2, %v1733_v57 }
 0x1f3   : > { %v449_v58 = vpop.trf.xlu1 }
 0x1f4   : > { %v1734_v59 = vpack.c.bf16 %v449_v58, %v449_v58 }
 0x1f5   : > { %v1833_v60 = vld [vmem:[#allocation3 + $0x68] sm:$0xff]  }
 0x1f6   : > { %610 = vst.msk [vmem:[#allocation3 + $0x74] sm:$0xf] %vm580_vm2, %v1734_v59  ;;  %1691 = vmatmul.mubr.msk.bf16.gmra.mxu1 %vm774_vm3, %v1833_v60 }
 0x1f7   : > { %v450_v61 = vpop.trf.xlu1  ;;  %1002 = vmatprep.mubr.bf16.mxu1 %v2081_v0 }
 0x1f8   : > { %v1735_v62 = vpack.c.bf16 %v450_v61, %v450_v61 }
 0x1fa   : > { %611 = vst.msk [vmem:[#allocation3 + $0x78] sm:$0xf] %vm580_vm2, %v1735_v62 }
 0x1fb   : > { %v451_v63 = vpop.trf.xlu1 }
 0x1fc   : > { %v1736_v1 = vpack.c.bf16 %v451_v63, %v451_v63 }
 0x1fd   : > { %v1834_v2 = vld [vmem:[#allocation3 + $0x70] sm:$0xff]  }
 0x1fe   : > { %612 = vst.msk [vmem:[#allocation3 + $0x7c] sm:$0xf] %vm580_vm2, %v1736_v1  ;;  %1692 = vmatmul.mubr.msk.bf16.gmra.mxu1 %vm774_vm3, %v1834_v2 }
 0x1ff   : > { %1012 = vmatprep.mubr.bf16.mxu1 %v2081_v0 }
 0x205   : > { %v1835_v3 = vld [vmem:[#allocation3 + $0x78] sm:$0xff]  }
 0x206   : > { %1693 = vmatmul.mubr.msk.bf16.gmra.mxu1 %vm774_vm3, %v1835_v3 }
 0x24e   : > { %v2321_v4 = vpop.f32.mrf.mxu1 }
 0x250   : > { %v2323_v5 = vpop.f32.mrf.mxu1 }
 0x252   : > { %v2325_v6 = vpop.f32.mrf.mxu1 }
 0x254   : > { %v2327_v7 = vpop.f32.mrf.mxu1 }
 0x256   : > { %v2329_v8 = vpop.f32.mrf.mxu1 }
 0x257   : > { %v1023_v55 = vmax.f32 %v2321_v4, %v2329_v8 }
 0x258   : > { %v2331_v9 = vpop.f32.mrf.mxu1 }
 0x25a   : > { %v2333_v10 = vpop.f32.mrf.mxu1 }
 0x25b   : > { %v1024_v56 = vmax.f32 %v2325_v6, %v2333_v10 }
 0x25c   : > { %v2335_v11 = vpop.f32.mrf.mxu1 }
 0x25d   : > { %2962 = vst [vmem:[#allocation14_spill] sm:$0xff] %v2335_v11 }
 0x25e   : > { %v2337_v0 = vpop.f32.mrf.mxu1 }
 0x25f   : > { %v1025_v58 = vmax.f32 %v1023_v55, %v2337_v0 }
 0x260   : > { %v2339_v12 = vpop.f32.mrf.mxu1 }
 0x262   : > { %v2341_v13 = vpop.f32.mrf.mxu1 }
 0x263   : > { %v1026_v59 = vmax.f32 %v1024_v56, %v2341_v13 }
 0x264   : > { %v2343_v14 = vpop.f32.mrf.mxu1 }
 0x265   : > { %2963 = vst [vmem:[#allocation15_spill] sm:$0xff] %v2343_v14 }
 0x266   : > { %v2345_v15 = vpop.f32.mrf.mxu1 }
 0x267   : > { %v1027_v61 = vmax.f32 %v1025_v58, %v2345_v15 }
 0x268   : > { %v2347_v16 = vpop.f32.mrf.mxu1 }
 0x26a   : > { %v2349_v17 = vpop.f32.mrf.mxu1 }
 0x26b   : > { %v1028_v62 = vmax.f32 %v1026_v59, %v2349_v17 }
 0x26c   : > { %v2351_v18 = vpop.f32.mrf.mxu1 }
 0x26d   : > { %2964 = vst [vmem:[#allocation16_spill] sm:$0xff] %v2351_v18 }
 0x26e   : > { %v2353_v19 = vpop.f32.mrf.mxu1 }
 0x26f   : > { %2965 = vst [vmem:[#allocation17_spill] sm:$0xff] %v2353_v19  ;;  %v1029_v1 = vmax.f32 %v1027_v61, %v2353_v19 }
 0x270   : > { %v2355_v20 = vpop.f32.mrf.mxu1 }
 0x271   : > { %2966 = vst [vmem:[#allocation18_spill] sm:$0xff] %v2355_v20 }
 0x272   : > { %v2357_v21 = vpop.f32.mrf.mxu1 }
 0x273   : > { %v1030_v2 = vmax.f32 %v1028_v62, %v2357_v21 }
 0x274   : > { %v2359_v22 = vpop.f32.mrf.mxu1 }
 0x275   : > { %2967 = vst [vmem:[#allocation19_spill] sm:$0xff] %v2359_v22 }
 0x276   : > { %v2361_v23 = vpop.f32.mrf.mxu1 }
 0x277   : > { %2968 = vst [vmem:[#allocation20_spill] sm:$0xff] %v2361_v23  ;;  %v1031_v43 = vmax.f32 %v1029_v1, %v2361_v23 }
 0x278   : > { %v2363_v24 = vpop.f32.mrf.mxu1 }
 0x27a   : > { %v2365_v25 = vpop.f32.mrf.mxu1 }
 0x27b   : > { %v1032_v55 = vmax.f32 %v1030_v2, %v2365_v25 }
 0x27c   : > { %v2367_v26 = vpop.f32.mrf.mxu1 }
 0x27e   : > { %v2369_v27 = vpop.f32.mrf.mxu1 }
 0x27f   : > { %2969 = vst [vmem:[#allocation21_spill] sm:$0xff] %v2369_v27  ;;  %v1033_v56 = vmax.f32 %v1031_v43, %v2369_v27 }
 0x280   : > { %v2371_v28 = vpop.f32.mrf.mxu1 }
 0x282   : > { %v2373_v29 = vpop.f32.mrf.mxu1 }
 0x283   : > { %v1034_v58 = vmax.f32 %v1032_v55, %v2373_v29  ;;  %v1061_v55 = vmax.f32 %v2327_v7, %v2335_v11 }
 0x284   : > { %v2375_v30 = vpop.f32.mrf.mxu1 }
 0x286   : > { %v2377_v31 = vpop.f32.mrf.mxu1 }
 0x287   : > { %v1035_v59 = vmax.f32 %v1033_v56, %v2377_v31 }
 0x288   : > { %v2379_v32 = vpop.f32.mrf.mxu1 }
 0x28a   : > { %v2381_v33 = vpop.f32.mrf.mxu1 }
 0x28b   : > { %2970 = vst [vmem:[#allocation22_spill] sm:$0xff] %v2381_v33  ;;  %v1036_v61 = vmax.f32 %v1034_v58, %v2381_v33 }
 0x28c   : > { %v2383_v34 = vpop.f32.mrf.mxu1 }
 0x28e   : > { %v2385_v35 = vpop.f32.mrf.mxu1 }
 0x28f   : > { %v1037_v62 = vmax.f32 %v1035_v59, %v2385_v35  ;;  %v1060_v59 = vmax.f32 %v2323_v5, %v2331_v9 }
 0x290   : > { %v2387_v36 = vpop.f32.mrf.mxu1 }
 0x292   : > { %v2389_v37 = vpop.f32.mrf.mxu1 }
 0x293   : > { %v1038_v1 = vmax.f32 %v1036_v61, %v2389_v37  ;;  %v1063_v61 = vmax.f32 %v1061_v55, %v2343_v14 }
 0x294   : > { %v2391_v38 = vpop.f32.mrf.mxu1 }
 0x295   : > { %v1065_v11 = vmax.f32 %v1063_v61, %v2351_v18 }
 0x296   : > { %v2393_v41 = vpop.f32.mrf.mxu1 }
 0x297   : > { %2971 = vst [vmem:[#allocation23_spill] sm:$0xff] %v2393_v41  ;;  %v1039_v2 = vmax.f32 %v1037_v62, %v2393_v41  ;;  %v1062_v41 = vmax.f32 %v1060_v59, %v2339_v12  ;;  %v1067_v55 = vmax.f32 %v1065_v11, %v2359_v22 }
 0x298   : > { %v2395_v42 = vpop.f32.mrf.mxu1 }
 0x299   : > { %v1069_v61 = vmax.f32 %v1067_v55, %v2367_v26 }
 0x29a   : > { %v2397_v44 = vpop.f32.mrf.mxu1 }
 0x29b   : > { %2972 = vst [vmem:[#allocation24_spill] sm:$0xff] %v2397_v44  ;;  %v1040_v43 = vmax.f32 %v1038_v1, %v2397_v44  ;;  %v1071_v11 = vmax.f32 %v1069_v61, %v2375_v30 }
 0x29c   : > { %v2399_v45 = vpop.f32.mrf.mxu1 }
 0x29e   : > { %v2401_v46 = vpop.f32.mrf.mxu1 }
 0x29f   : > { %2973 = vst [vmem:[#allocation25_spill] sm:$0xff] %v2401_v46  ;;  %v1041_v56 = vmax.f32 %v1039_v2, %v2401_v46  ;;  %v1064_v46 = vmax.f32 %v1062_v41, %v2347_v16 }
 0x2a0   : > { %v2403_v47 = vpop.f32.mrf.mxu1 }
 0x2a1   : > { %v1066_v59 = vmax.f32 %v1064_v46, %v2355_v20  ;;  %v1073_v46 = vmax.f32 %v1071_v11, %v2383_v34 }
 0x2a2   : > { %v2405_v48 = vpop.f32.mrf.mxu1 }
 0x2a3   : > { %2974 = vst [vmem:[#allocation26_spill] sm:$0xff] %v2405_v48  ;;  %v1042_v58 = vmax.f32 %v1040_v43, %v2405_v48  ;;  %v1068_v41 = vmax.f32 %v1066_v59, %v2363_v24 }
 0x2a4   : > { %v2407_v49 = vpop.f32.mrf.mxu1 }
 0x2a5   : > { %v1070_v22 = vmax.f32 %v1068_v41, %v2371_v28 }
 0x2a6   : > { %v2409_v50 = vpop.f32.mrf.mxu1 }
 0x2a7   : > { %v1043_v62 = vmax.f32 %v1041_v56, %v2409_v50  ;;  %v1072_v55 = vmax.f32 %v1070_v22, %v2379_v32 }
 0x2a8   : > { %v2411_v51 = vpop.f32.mrf.mxu1 }
 0x2aa   : > { %v2413_v52 = vpop.f32.mrf.mxu1 }
 0x2ab   : > { %v1044_v1 = vmax.f32 %v1042_v58, %v2413_v52 }
 0x2ac   : > { %v2415_v53 = vpop.f32.mrf.mxu1 }
 0x2ae   : > { %v2417_v54 = vpop.f32.mrf.mxu1 }
 0x2af   : > { %v1045_v2 = vmax.f32 %v1043_v62, %v2417_v54 }
 0x2b0   : > { %v2423_v57 = vpop.f32.mrf.mxu1 }
 0x2b2   : > { %v2427_v60 = vpop.f32.mrf.mxu1 }
 0x2b3   : > { %v1046_v43 = vmax.f32 %v1044_v1, %v2427_v60 }
 0x2b4   : > { %v2431_v63 = vpop.f32.mrf.mxu1 }
 0x2b6   : > { %v2435_v3 = vpop.f32.mrf.mxu1 }
 0x2b7   : > { %v1047_v56 = vmax.f32 %v1045_v2, %v2435_v3 }
 0x2b8   : > { %v2439_v39 = vpop.f32.mrf.mxu1 }
 0x2ba   : > { %v2443_v40 = vpop.f32.mrf.mxu1 }
 0x2bb   : > { %v1048_v58 = vmax.f32 %v1046_v43, %v2443_v40 }
 0x2bc   : > { %v2447_v19 = vpop.f32.mrf.mxu1 }
 0x2be   : > { %v2451_v23 = vpop.f32.mrf.mxu1 }
 0x2bf   : > { %2975 = vst [vmem:[#allocation27_spill] sm:$0xff] %v2451_v23  ;;  %v1049_v62 = vmax.f32 %v1047_v56, %v2451_v23  ;;  %v1075_v56 = vmax.f32 %v1073_v46, %v2391_v38 }
 0x2c0   : > { %v2455_v27 = vpop.f32.mrf.mxu1 }
 0x2c1   : > { %v1077_v59 = vmax.f32 %v1075_v56, %v2399_v45 }
 0x2c2   : > { %v2461_v33 = vpop.f32.mrf.mxu1 }
 0x2c3   : > { %2976 = vst [vmem:[#allocation28_spill] sm:$0xff] %v2461_v33  ;;  %v1050_v1 = vmax.f32 %v1048_v58, %v2461_v33  ;;  %v1074_v33 = vmax.f32 %v1072_v55, %v2387_v36 }
 0x2c4   : > { %v2468_v44 = vpop.f32.mrf.mxu1 }
 0x2c5   : > { %v1076_v61 = vmax.f32 %v1074_v33, %v2395_v42 }
 0x2c6   : > { %v2474_v48 = vpop.f32.mrf.mxu1 }
 0x2c7   : > { %v1051_v2 = vmax.f32 %v1049_v62, %v2474_v48  ;;  %v1079_v62 = vmax.f32 %v1077_v59, %v2407_v49  ;;  %v1078_v41 = vmax.f32 %v1076_v61, %v2403_v47 }
 0x2c8   : > { %v2480_v14 = vpop.f32.mrf.mxu1 }
 0x2c9   : > { %v1081_v11 = vmax.f32 %v1079_v62, %v2415_v53  ;;  %v1080_v22 = vmax.f32 %v1078_v41, %v2411_v51 }
 0x2ca   : > { %v2486_v18 = vpop.f32.mrf.mxu1 }
 0x2cb   : > { %v1052_v43 = vmax.f32 %v1050_v1, %v2486_v18  ;;  %v1082_v55 = vmax.f32 %v1080_v22, %v2423_v57 }
 0x2cd   : > { %v1053_v20 = vmax.f32 %v1051_v2, %v1052_v43  ;;  %v1083_v43 = vmax.f32 %v1081_v11, %v2431_v63  ;;  %v1084_v33 = vmax.f32 %v1082_v55, %v2439_v39 }
 0x2cf   : > { %v1054_v58 = vrot.slane %v1053_v20, 4  ;;  %v1085_v56 = vmax.f32 %v1083_v43, %v2447_v19  ;;  %v1086_v61 = vmax.f32 %v1084_v33, %v2455_v27 }
 0x2d1   : > { %v1055_v23 = vmax.f32 %v1053_v20, %v1054_v58  ;;  %v2506_v20 = vpop.f32.mrf.mxu1  ;;  %v1087_v58 = vmax.f32 %v1085_v56, %v2468_v44  ;;  %v1088_v62 = vmax.f32 %v1086_v61, %v2480_v14 }
 0x2d3   : > { %v1056_v1 = vrot.slane %v1055_v23, 2 }
 0x2d5   : > { %v1057_v2 = vmax.f32 %v1055_v23, %v1056_v1  ;;  %v1089_v23 = vmax.f32 %v1087_v58, %v2506_v20 }
 0x2d7   : > { %v1058_v46 = vrot.slane %v1057_v2, 1  ;;  %v1090_v22 = vmax.f32 %v1088_v62, %v1089_v23 }
 0x2d9   : > { %v2510_v59 = vmax.f32 %v1057_v2, %v1058_v46  ;;  %v1091_v33 = vrot.slane %v1090_v22, 4 }
 0x2db   : > { %v1097_v1 = vsub.f32 %v2321_v4, %v2510_v59  ;;  %v1099_v41 = vsub.f32 %v2325_v6, %v2510_v59  ;;  %v1101_v11 = vsub.f32 %v2329_v8, %v2510_v59  ;;  %v1103_v2 = vsub.f32 %v2333_v10, %v2510_v59 }
 0x2dc   : > { %v1105_v55 = vsub.f32 %v2337_v0, %v2510_v59  ;;  %v1107_v4 = vsub.f32 %v2341_v13, %v2510_v59  ;;  %v1109_v8 = vsub.f32 %v2345_v15, %v2510_v59  ;;  %v1092_v61 = vmax.f32 %v1090_v22, %v1091_v33  ;;  %v2977_v0 = vld [vmem:[#allocation17_spill] sm:$0xff] }
 0x2dd   : > { %v1161_v43 = vmul.f32 1.442695, %v1097_v1  ;;  %v1165_v46 = vmul.f32 1.442695, %v1099_v41  ;;  %v1169_v56 = vmul.f32 1.442695, %v1101_v11  ;;  %v1111_v10 = vsub.f32 %v2349_v17, %v2510_v59 }
 0x2de   : > { %v1173_v6 = vmul.f32 1.442695, %v1103_v2  ;;  %v1177_v58 = vmul.f32 1.442695, %v1105_v55  ;;  %v1181_v23 = vmul.f32 1.442695, %v1107_v4  ;;  %v1113_v62 = vsub.f32 %v2977_v0, %v2510_v59 }
 0x2df   : > { %1836 = vpow2.f32 %v1161_v43  ;;  %v1185_v1 = vmul.f32 1.442695, %v1109_v8  ;;  %v1115_v13 = vsub.f32 %v2357_v21, %v2510_v59  ;;  %v1093_v41 = vrot.slane %v1092_v61, 2  ;;  %v2978_v11 = vld [vmem:[#allocation20_spill] sm:$0xff]  ;;  %v2979_v17 = vld [vmem:[#allocation21_spill] sm:$0xff] }
 0x2e0   : > { %1838 = vpow2.f32 %v1165_v46  ;;  %v1117_v15 = vsub.f32 %v2978_v11, %v2510_v59  ;;  %v1189_v2 = vmul.f32 1.442695, %v1111_v10  ;;  %v1119_v22 = vsub.f32 %v2365_v25, %v2510_v59 }
 0x2e1   : > { %1840 = vpow2.f32 %v1169_v56  ;;  %v1121_v43 = vsub.f32 %v2979_v17, %v2510_v59  ;;  %v1193_v46 = vmul.f32 1.442695, %v1113_v62  ;;  %v1123_v55 = vsub.f32 %v2373_v29, %v2510_v59 }
 0x2e2   : > { %1842 = vpow2.f32 %v1173_v6  ;;  %v1197_v56 = vmul.f32 1.442695, %v1115_v13  ;;  %v1094_v33 = vmax.f32 %v1092_v61, %v1093_v41  ;;  %v1125_v4 = vsub.f32 %v2377_v31, %v2510_v59 }
 0x2e3   : > { %1844 = vpow2.f32 %v1177_v58  ;;  %v1201_v6 = vmul.f32 1.442695, %v1117_v15  ;;  %v1141_v25 = vsub.f32 %v2409_v50, %v2510_v59  ;;  %v1205_v58 = vmul.f32 1.442695, %v1119_v22 }
 0x2e4   : > { %1846 = vpow2.f32 %v1181_v23  ;;  %v1143_v10 = vsub.f32 %v2413_v52, %v2510_v59  ;;  %v1209_v29 = vmul.f32 1.442695, %v1121_v43  ;;  %v1145_v31 = vsub.f32 %v2417_v54, %v2510_v59 }
 0x2e5   : > { %1848 = vpow2.f32 %v1185_v1  ;;  %v1213_v0 = vmul.f32 1.442695, %v1123_v55  ;;  %v1095_v62 = vrot.slane %v1094_v33, 1  ;;  %v1147_v50 = vsub.f32 %v2427_v60, %v2510_v59  ;;  %v2981_v60 = vld [vmem:[#allocation22_spill] sm:$0xff] }
 0x2e6   : > { %1850 = vpow2.f32 %v1189_v2  ;;  %v1217_v1 = vmul.f32 1.442695, %v1125_v4  ;;  %v1149_v41 = vsub.f32 %v2435_v3, %v2510_v59  ;;  %v1249_v11 = vmul.f32 1.442695, %v1141_v25  ;;  %v2982_v25 = vld [vmem:[#allocation23_spill] sm:$0xff] }
 0x2e7   : > { %1852 = vpow2.f32 %v1193_v46  ;;  %v1151_v54 = vsub.f32 %v2443_v40, %v2510_v59  ;;  %v1253_v15 = vmul.f32 1.442695, %v1143_v10  ;;  %v1127_v17 = vsub.f32 %v2981_v60, %v2510_v59 }
 0x2e8   : > { %1854 = vpow2.f32 %v1197_v56  ;;  %v1257_v43 = vmul.f32 1.442695, %v1145_v31  ;;  %v2573_v46 = vmax.f32 %v1094_v33, %v1095_v62  ;;  %v1129_v3 = vsub.f32 %v2385_v35, %v2510_v59 }
 0x2e9   : > { %1856 = vpow2.f32 %v1201_v6  ;;  %v1261_v55 = vmul.f32 1.442695, %v1147_v50  ;;  %v1131_v4 = vsub.f32 %v2389_v37, %v2510_v59  ;;  %v1265_v6 = vmul.f32 1.442695, %v1149_v41  ;;  %v2983_v50 = vld [vmem:[#allocation24_spill] sm:$0xff] }
 0x2ea   : > { %1858 = vpow2.f32 %v1205_v58  ;;  %v1133_v58 = vsub.f32 %v2982_v25, %v2510_v59  ;;  %v1269_v33 = vmul.f32 1.442695, %v1151_v54  ;;  %v1221_v35 = vmul.f32 1.442695, %v1127_v17 }
 0x2eb   : > { %1860 = vpow2.f32 %v1209_v29  ;;  %v1225_v31 = vmul.f32 1.442695, %v1129_v3 }
 0x2ec   : > { %v2543_v21 = vpop.eup %1836  ;;  %1862 = vpow2.f32 %v1213_v0  ;;  %v1100_v0 = vsub.f32 %v2327_v7, %v2573_v46  ;;  %v1233_v41 = vmul.f32 1.442695, %v1133_v58 }
 0x2ed   : > { %v2547_v8 = vpop.eup %1838  ;;  %1864 = vpow2.f32 %v1217_v1  ;;  %v1135_v1 = vsub.f32 %v2983_v50, %v2510_v59 }
 0x2ee   : > { %2980 = vst [vmem:[#allocation17_spill] sm:$0xff] %v2547_v8  ;;  %v1289_v61 = vadd.f32 %v2547_v8, %v2543_v21  ;;  %v2555_v23 = vpop.eup %1840  ;;  %1866 = vpow2.f32 %v1249_v11 }
 0x2ef   : > { %v2562_v13 = vpop.eup %1842  ;;  %1868 = vpow2.f32 %v1253_v15  ;;  %v2984_v15 = vld [vmem:[#allocation25_spill] sm:$0xff] }
 0x2f0   : > { %v1290_v52 = vadd.f32 %v2555_v23, %v1289_v61  ;;  %v2569_v22 = vpop.eup %1844  ;;  %1870 = vpow2.f32 %v1257_v43  ;;  %v1098_v61 = vsub.f32 %v2323_v5, %v2573_v46  ;;  %v1102_v5 = vsub.f32 %v2331_v9, %v2573_v46  ;;  %v2985_v43 = vld [vmem:[#allocation14_spill] sm:$0xff] }
 0x2f1   : > { %v2578_v56 = vpop.eup %1846  ;;  %1872 = vpow2.f32 %v1261_v55  ;;  %v1104_v3 = vsub.f32 %v2985_v43, %v2573_v46  ;;  %v1167_v55 = vmul.f32 1.442695, %v1100_v0  ;;  %v2986_v9 = vld [vmem:[#allocation26_spill] sm:$0xff] }
 0x2f2   : > { %v1291_v2 = vadd.f32 %v2562_v13, %v1290_v52  ;;  %v2585_v29 = vpop.eup %1848  ;;  %v1229_v52 = vmul.f32 1.442695, %v1131_v4  ;;  %1874 = vpow2.f32 %v1265_v6  ;;  %v1163_v7 = vmul.f32 1.442695, %v1098_v61 }
 0x2f3   : > { %v2592_v62 = vpop.eup %1850  ;;  %1876 = vpow2.f32 %v1269_v33  ;;  %v1139_v4 = vsub.f32 %v2986_v9, %v2510_v59  ;;  %v1237_v6 = vmul.f32 1.442695, %v1135_v1  ;;  %v1106_v33 = vsub.f32 %v2339_v12, %v2573_v46 }
 0x2f4   : > { %v1292_v40 = vadd.f32 %v2569_v22, %v1291_v2  ;;  %v2599_v54 = vpop.eup %1852  ;;  %v1137_v2 = vsub.f32 %v2984_v15, %v2510_v59  ;;  %1878 = vpow2.f32 %v1221_v35  ;;  %v1110_v1 = vsub.f32 %v2347_v16, %v2573_v46 }
 0x2f5   : > { %v2603_v60 = vpop.eup %1854  ;;  %1880 = vpow2.f32 %v1225_v31  ;;  %v2987_v31 = vld [vmem:[#allocation15_spill] sm:$0xff]  ;;  %v1245_v12 = vmul.f32 1.442695, %v1139_v4  ;;  %v1179_v43 = vmul.f32 1.442695, %v1106_v33  ;;  %v1122_v16 = vsub.f32 %v2371_v28, %v2573_v46 }
 0x2f6   : > { %v1293_v10 = vadd.f32 %v2578_v56, %v1292_v40  ;;  %v2608_v40 = vpop.eup %1856  ;;  %1882 = vpow2.f32 %v1229_v52  ;;  %v1241_v61 = vmul.f32 1.442695, %v1137_v2  ;;  %v1175_v52 = vmul.f32 1.442695, %v1104_v3 }
 0x2f7   : > { %v2612_v25 = vpop.eup %1858  ;;  %1884 = vpow2.f32 %v1233_v41  ;;  %v1124_v3 = vsub.f32 %v2375_v30, %v2573_v46  ;;  %v1128_v28 = vsub.f32 %v2383_v34, %v2573_v46 }
 0x2f8   : > { %v1294_v37 = vadd.f32 %v2585_v29, %v1293_v10  ;;  %v1171_v10 = vmul.f32 1.442695, %v1102_v5  ;;  %v2617_v35 = vpop.eup %1860  ;;  %1886 = vpow2.f32 %v1163_v7  ;;  %v2989_v7 = vld [vmem:[#allocation18_spill] sm:$0xff] }
 0x2f9   : > { %v2621_v0 = vpop.eup %1862  ;;  %1888 = vpow2.f32 %v1167_v55 }
 0x2fa   : > { %v1295_v11 = vadd.f32 %v2592_v62, %v1294_v37  ;;  %v1108_v37 = vsub.f32 %v2987_v31, %v2573_v46  ;;  %v2626_v41 = vpop.eup %1864  ;;  %1890 = vpow2.f32 %v1237_v6 }
 0x2fb   : > { %v2630_v15 = vpop.eup %1866  ;;  %1892 = vpow2.f32 %v1171_v10 }
 0x2fc   : > { %v1296_v17 = vadd.f32 %v2599_v54, %v1295_v11  ;;  %v2988_v11 = vld [vmem:[#allocation16_spill] sm:$0xff]  ;;  %v2635_v9 = vpop.eup %1868  ;;  %1894 = vpow2.f32 %v1241_v61  ;;  %v1183_v55 = vmul.f32 1.442695, %v1108_v37  ;;  %v1126_v61 = vsub.f32 %v2379_v32, %v2573_v46 }
 0x2fd   : > { %v1112_v5 = vsub.f32 %v2988_v11, %v2573_v46  ;;  %v2641_v4 = vpop.eup %1870  ;;  %1896 = vpow2.f32 %v1175_v52  ;;  %v1211_v32 = vmul.f32 1.442695, %v1122_v16 }
 0x2fe   : > { %v1297_v58 = vadd.f32 %v2603_v60, %v1296_v17  ;;  %v1114_v17 = vsub.f32 %v2989_v7, %v2573_v46  ;;  %v2646_v33 = vpop.eup %1872  ;;  %1898 = vpow2.f32 %v1245_v12  ;;  %v2990_v12 = vld [vmem:[#allocation19_spill] sm:$0xff] }
 0x2ff   : > { %v1191_v30 = vmul.f32 1.442695, %v1112_v5  ;;  %v2652_v31 = vpop.eup %1874  ;;  %1900 = vpow2.f32 %v1179_v43  ;;  %v1116_v11 = vsub.f32 %v2990_v12, %v2573_v46  ;;  %v1215_v5 = vmul.f32 1.442695, %v1124_v3 }
 0x300   : > { %v1298_v50 = vadd.f32 %v2608_v40, %v1297_v58  ;;  %v1187_v58 = vmul.f32 1.442695, %v1110_v1  ;;  %v2657_v52 = vpop.eup %1876  ;;  %1902 = vpow2.f32 %v1183_v55  ;;  %v1118_v43 = vsub.f32 %v2363_v24, %v2573_v46 }
 0x301   : > { %v1120_v55 = vsub.f32 %v2367_v26, %v2573_v46  ;;  %v1199_v1 = vmul.f32 1.442695, %v1116_v11  ;;  %v2996_v11 = vld [vmem:[#allocation28_spill] sm:$0xff] }
 0x302   : > { %v1299_v2 = vadd.f32 %v2612_v25, %v1298_v50  ;;  %v1195_v50 = vmul.f32 1.442695, %v1114_v17  ;;  %1904 = vpow2.f32 %v1187_v58  ;;  %v1223_v58 = vmul.f32 1.442695, %v1128_v28 }
 0x303   : > { %1906 = vpow2.f32 %v1191_v30  ;;  %v1207_v28 = vmul.f32 1.442695, %v1120_v55 }
 0x304   : > { %v1300_v6 = vadd.f32 %v2617_v35, %v1299_v2  ;;  %v2661_v2 = vpop.eup %1878  ;;  %1908 = vpow2.f32 %v1195_v50 }
 0x305   : > { %v2666_v17 = vpop.eup %1880  ;;  %1910 = vpow2.f32 %v1211_v32 }
 0x306   : > { %v1301_v37 = vadd.f32 %v2621_v0, %v1300_v6  ;;  %2991 = vst [vmem:[#allocation20_spill] sm:$0xff] %v2666_v17  ;;  %v1219_v6 = vmul.f32 1.442695, %v1126_v61  ;;  %v2670_v10 = vpop.eup %1882  ;;  %1912 = vpow2.f32 %v1215_v5  ;;  %v2994_v61 = vld [vmem:[#allocation27_spill] sm:$0xff]  ;;  %v1155_v5 = vsub.f32 %v2996_v11, %v2510_v59 }
 0x307   : > { %2992 = vst [vmem:[#allocation21_spill] sm:$0xff] %v2670_v10  ;;  %v2675_v3 = vpop.eup %1884  ;;  %v1153_v30 = vsub.f32 %v2994_v61, %v2510_v59  ;;  %v1150_v61 = vsub.f32 %v2439_v39, %v2573_v46 }
 0x308   : > { %v1302_v34 = vadd.f32 %v2626_v41, %v1301_v37  ;;  %2993 = vst [vmem:[#allocation22_spill] sm:$0xff] %v2675_v3  ;;  %v2677_v37 = vpop.eup %1886  ;;  %1914 = vpow2.f32 %v1219_v6 }
 0x309   : > { %v2680_v24 = vpop.eup %1888  ;;  %1916 = vpow2.f32 %v1223_v58  ;;  %v1273_v58 = vmul.f32 1.442695, %v1153_v30  ;;  %v1159_v30 = vsub.f32 %v2486_v18, %v2510_v59 }
 0x30a   : > { %v1303_v16 = vadd.f32 %v2661_v2, %v1302_v34  ;;  %v1203_v34 = vmul.f32 1.442695, %v1118_v43  ;;  %v2684_v7 = vpop.eup %1890  ;;  %v1326_v50 = vadd.f32 %v2680_v24, %v2677_v37  ;;  %v1157_v43 = vsub.f32 %v2474_v48, %v2510_v59 }
 0x30b   : > { %2995 = vst [vmem:[#allocation23_spill] sm:$0xff] %v2684_v7  ;;  %v2689_v32 = vpop.eup %1892  ;;  %1918 = vpow2.f32 %v1199_v1  ;;  %v1132_v59 = vsub.f32 %v2391_v38, %v2573_v46 }
 0x30c   : > { %v1304_v12 = vadd.f32 %v2666_v17, %v1303_v16  ;;  %v2693_v16 = vpop.eup %1894  ;;  %1920 = vpow2.f32 %v1203_v34  ;;  %v1152_v17 = vsub.f32 %v2447_v19, %v2573_v46  ;;  %v1281_v39 = vmul.f32 1.442695, %v1157_v43 }
 0x30d   : > { %v2699_v55 = vpop.eup %1896  ;;  %1922 = vpow2.f32 %v1207_v28  ;;  %v1130_v19 = vsub.f32 %v2387_v36, %v2573_v46  ;;  %v1267_v28 = vmul.f32 1.442695, %v1150_v61 }
 0x30e   : > { %v1305_v26 = vadd.f32 %v2670_v10, %v1304_v12  ;;  %v1327_v12 = vadd.f32 %v2689_v32, %v1326_v50  ;;  %v2703_v10 = vpop.eup %1898  ;;  %1924 = vpow2.f32 %v1273_v58  ;;  %v1134_v58 = vsub.f32 %v2395_v42, %v2573_v46 }
 0x30f   : > { %2997 = vst [vmem:[#allocation24_spill] sm:$0xff] %v2703_v10  ;;  %v2709_v1 = vpop.eup %1900 }
 0x310   : > { %v1306_v6 = vadd.f32 %v2675_v3, %v1305_v26  ;;  %v1328_v48 = vadd.f32 %v2699_v55, %v1327_v12  ;;  %v1277_v26 = vmul.f32 1.442695, %v1155_v5  ;;  %v2711_v50 = vpop.eup %1902 }
 0x312   : > { %v1307_v11 = vadd.f32 %v2684_v7, %v1306_v6  ;;  %v1329_v3 = vadd.f32 %v2709_v1, %v1328_v48  ;;  %v2717_v6 = vpop.eup %1904  ;;  %v1271_v7 = vmul.f32 1.442695, %v1152_v17  ;;  %1926 = vpow2.f32 %v1277_v26 }
 0x313   : > { %v2721_v12 = vpop.eup %1906  ;;  %1928 = vpow2.f32 %v1281_v39  ;;  %v1227_v26 = vmul.f32 1.442695, %v1130_v19  ;;  %v1231_v39 = vmul.f32 1.442695, %v1132_v59  ;;  %v1235_v19 = vmul.f32 1.442695, %v1134_v58 }
 0x314   : > { %v1308_v34 = vadd.f32 %v2693_v16, %v1307_v11  ;;  %v1330_v8 = vadd.f32 %v2711_v50, %v1329_v3  ;;  %v2725_v18 = vpop.eup %1908  ;;  %v1285_v11 = vmul.f32 1.442695, %v1159_v30  ;;  %1930 = vpow2.f32 %v1267_v28 }
 0x315   : > { %v1911_v43 = vpop.eup %1910  ;;  %1932 = vpow2.f32 %v1271_v7  ;;  %v1136_v30 = vsub.f32 %v2399_v45, %v2573_v46  ;;  %v1138_v7 = vsub.f32 %v2403_v47, %v2573_v46 }
 0x316   : > { %v1309_v5 = vadd.f32 %v2703_v10, %v1308_v34  ;;  %v1331_v61 = vadd.f32 %v2717_v6, %v1330_v8  ;;  %v1913_v48 = vpop.eup %1912  ;;  %1934 = vpow2.f32 %v1285_v11  ;;  %v1142_v10 = vsub.f32 %v2411_v51, %v2573_v46 }
 0x317   : > { %v2733_v17 = vpop.eup %1914  ;;  %1936 = vpow2.f32 %v1227_v26  ;;  %v1380_v11 = vpack.c.bf16 %v1913_v48, %v1911_v43  ;;  %v1239_v58 = vmul.f32 1.442695, %v1136_v30  ;;  %v1160_v26 = vsub.f32 %v2506_v20, %v2573_v46 }
 0x318   : > { %v1310_v36 = vadd.f32 %v2630_v15, %v1309_v5  ;;  %v1332_v38 = vadd.f32 %v2721_v12, %v1331_v61  ;;  %v2737_v34 = vpop.eup %1916  ;;  %1938 = vpow2.f32 %v1231_v39  ;;  %v1144_v30 = vsub.f32 %v2415_v53, %v2573_v46 }
 0x319   : > { %v1382_v28 = vpack.c.bf16 %v2737_v34, %v2733_v17  ;;  %v1919_v5 = vpop.eup %1918  ;;  %1940 = vpow2.f32 %v1235_v19  ;;  %v1154_v20 = vsub.f32 %v2455_v27, %v2573_v46  ;;  %v1156_v53 = vsub.f32 %v2468_v44, %v2573_v46 }
 0x31a   : > { %v1311_v3 = vadd.f32 %v2635_v9, %v1310_v36  ;;  %v1333_v42 = vadd.f32 %v2725_v18, %v1332_v38  ;;  %v1381_v36 = vpack.c.bf16 %v2661_v2, %v2626_v41  ;;  %v1921_v61 = vpop.eup %1920  ;;  %v1140_v38 = vsub.f32 %v2407_v49, %v2573_v46 }
 0x31b   : > { %1419 = vmatprep.subr.bf16.mxu0 %v1382_v28  ;;  %v1158_v2 = vsub.f32 %v2480_v14, %v2573_v46  ;;  %v1379_v49 = vpack.c.bf16 %v2621_v0, %v2617_v35  ;;  %v1146_v14 = vsub.f32 %v2423_v57, %v2573_v46  ;;  %1942 = vpow2.f32 %v1239_v58 }
 0x31c   : > { %v1312_v8 = vadd.f32 %v2641_v4, %v1311_v3  ;;  %v1334_v59 = vadd.f32 %v1919_v5, %v1333_v42  ;;  %v1923_v3 = vpop.eup %1922  ;;  %1420 = vmatpush1.bf16.msra.mxu0 %v1381_v36  ;;  %v1247_v39 = vmul.f32 1.442695, %v1140_v38  ;;  %v1251_v0 = vmul.f32 1.442695, %v1142_v10 }
 0x31d   : > { %1421 = vmatprep.subr.bf16.mxu0 %v1380_v11  ;;  %v1378_v28 = vpack.c.bf16 %v1923_v3, %v1921_v61  ;;  %v2762_v36 = vpop.eup %1924  ;;  %v1287_v57 = vmul.f32 1.442695, %v1160_v26  ;;  %v1377_v27 = vpack.c.bf16 %v2612_v25, %v2608_v40  ;;  %v1376_v10 = vpack.c.bf16 %v1919_v5, %v2725_v18 }
 0x31e   : > { %v1313_v45 = vadd.f32 %v2646_v33, %v1312_v8  ;;  %v1335_v41 = vadd.f32 %v1921_v61, %v1334_v59  ;;  %v1243_v8 = vmul.f32 1.442695, %v1138_v7  ;;  %v1148_v38 = vsub.f32 %v2431_v63, %v2573_v46 }
 0x31f   : > { %v2770_v7 = vpop.eup %1926  ;;  %v1255_v44 = vmul.f32 1.442695, %v1144_v30  ;;  %v1275_v18 = vmul.f32 1.442695, %v1154_v20  ;;  %v1279_v5 = vmul.f32 1.442695, %v1156_v53  ;;  %v1375_v63 = vpack.c.bf16 %v2603_v60, %v2599_v54 }
 0x320   : > { %v1314_v47 = vadd.f32 %v2652_v31, %v1313_v45  ;;  %v1336_v51 = vadd.f32 %v1923_v3, %v1335_v41  ;;  %1422 = vmatpush1.bf16.msra.mxu0 %v1379_v49  ;;  %v2773_v61 = vpop.eup %1928  ;;  %v1283_v45 = vmul.f32 1.442695, %v1158_v2  ;;  %1944 = vpow2.f32 %v1243_v8 }
 0x321   : > { %1423 = vmatprep.subr.bf16.mxu0 %v1378_v28  ;;  %v2779_v59 = vpop.eup %1930  ;;  %1946 = vpow2.f32 %v1247_v39  ;;  %v1374_v2 = vpack.c.bf16 %v2721_v12, %v2717_v6  ;;  %v1263_v26 = vmul.f32 1.442695, %v1148_v38  ;;  %v1373_v54 = vpack.c.bf16 %v2592_v62, %v2585_v29 }
 0x322   : > { %v1315_v42 = vadd.f32 %v2657_v52, %v1314_v47  ;;  %v1337_v19 = vadd.f32 %v1911_v43, %v1336_v51  ;;  %v2783_v43 = vpop.eup %1932  ;;  %v1259_v47 = vmul.f32 1.442695, %v1146_v14  ;;  %1948 = vpow2.f32 %v1251_v0 }
 0x323   : > { %v1394_v25 = vpack.c.bf16 %v2783_v43, %v2779_v59  ;;  %1950 = vpow2.f32 %v1283_v45  ;;  %v1372_v6 = vpack.c.bf16 %v2711_v50, %v2709_v1  ;;  %v1371_v51 = vpack.c.bf16 %v2578_v56, %v2569_v22 }
 0x324   : > { %v1316_v35 = vadd.f32 %v2762_v36, %v1315_v42  ;;  %v1338_v3 = vadd.f32 %v1913_v48, %v1337_v19  ;;  %1424 = vmatpush1.bf16.msra.mxu0 %v1377_v27  ;;  %v1935_v48 = vpop.eup %1934  ;;  %1952 = vpow2.f32 %v1287_v57  ;;  %v1370_v29 = vpack.c.bf16 %v2699_v55, %v2689_v32  ;;  %v2998_v55 = vld [vmem:[#allocation17_spill] sm:$0xff] }
 0x325   : > { %1425 = vmatprep.subr.bf16.mxu0 %v1376_v10  ;;  %1954 = vpow2.f32 %v1255_v44  ;;  %v1369_v50 = vpack.c.bf16 %v2562_v13, %v2555_v23  ;;  %v1367_v19 = vpack.c.bf16 %v2998_v55, %v2543_v21  ;;  %v1395_v10 = vpack.c.bf16 %v2770_v7, %v2762_v36 }
 0x326   : > { %v1317_v11 = vadd.f32 %v2770_v7, %v1316_v35  ;;  %v1339_v40 = vadd.f32 %v2733_v17, %v1338_v3  ;;  %v2798_v17 = vpop.eup %1936  ;;  %1956 = vpow2.f32 %v1259_v47  ;;  %v1368_v35 = vpack.c.bf16 %v2680_v24, %v2677_v37 }
 0x327   : > { %v2801_v49 = vpop.eup %1938  ;;  %1958 = vpow2.f32 %v1275_v18  ;;  %v3000_v36 = vpack.c.bf16 %v2646_v33, %v2641_v4  ;;  %v3004_v4 = vld [vmem:[#allocation23_spill] sm:$0xff] }
 0x328   : > { %v1318_v58 = vadd.f32 %v2773_v61, %v1317_v11  ;;  %v1340_v41 = vadd.f32 %v2737_v34, %v1339_v40  ;;  %1426 = vmatpush1.bf16.msra.mxu0 %v1375_v63  ;;  %1960 = vpow2.f32 %v1279_v5  ;;  %v2808_v12 = vpop.eup %1940  ;;  %v1397_v11 = vpack.c.bf16 %v1935_v48, %v2773_v61  ;;  %v370_v40 = vpop.f32.mrf.mxu0 }
 0x329   : > { %1427 = vmatprep.subr.bf16.mxu0 %v1374_v2  ;;  %1962 = vpow2.f32 %v1263_v26  ;;  %v1943_v42 = vpop.eup %1942  ;;  %v2999_v61 = vpack.c.bf16 %v2657_v52, %v2652_v31  ;;  %v3002_v31 = vld [vmem:[#allocation24_spill] sm:$0xff]  ;;  %v1384_v26 = vpack.c.bf16 %v2801_v49, %v2798_v17 }
 0x32a   : > { %v2793_v46 = vadd.f32 %v1935_v48, %v1318_v58  ;;  %v1341_v8 = vadd.f32 %v2798_v17, %v1340_v41  ;;  %v372_v7 = vpop.f32.mrf.mxu0  ;;  %v1387_v52 = vpack.c.bf16 %v3002_v31, %v2693_v16  ;;  %v1386_v63 = vpack.c.bf16 %v1943_v42, %v2808_v12  ;;  %v3003_v41 = vld [vmem:[#allocation22_spill] sm:$0xff] }
 0x32b   : > { %v1385_v33 = vpack.c.bf16 %v3004_v4, %v3003_v41 }
 0x32c   : > { %v1342_v60 = vadd.f32 %v2801_v49, %v1341_v8  ;;  %1428 = vmatpush1.bf16.msra.mxu0 %v1373_v54  ;;  %v3005_v8 = vld [vmem:[#allocation20_spill] sm:$0xff]  ;;  %v3006_v54 = vld [vmem:[#allocation21_spill] sm:$0xff]  ;;  %v1320_v17 = vrot.slane %v2793_v46, 4 }
 0x32d   : > { %1429 = vmatprep.subr.bf16.mxu0 %v1372_v6  ;;  %v1945_v62 = vpop.eup %1944  ;;  %v1383_v16 = vpack.c.bf16 %v3006_v54, %v3005_v8 }
 0x32e   : > { %v1343_v34 = vadd.f32 %v2808_v12, %v1342_v60  ;;  %v1947_v30 = vpop.eup %1946  ;;  %v3007_v12 = vld [vmem:[#allocation13_spill] sm:$0xff] }
 0x32f   : > { %v1949_v1 = vpop.eup %1948  ;;  %v1388_v5 = vpack.c.bf16 %v1947_v30, %v1945_v62 }
 0x330   : > { %v1344_v28 = vadd.f32 %v1943_v42, %v1343_v34  ;;  %1430 = vmatpush1.bf16.msra.mxu0 %v1371_v51  ;;  %v1951_v20 = vpop.eup %1950  ;;  %v3008_v34 = vld [vmem:[#allocation12_spill] sm:$0xff] }
 0x331   : > { %1431 = vmatprep.subr.bf16.mxu0 %v1370_v29  ;;  %v1953_v0 = vpop.eup %1952  ;;  %v3009_v42 = vpack.c.bf16 %v3007_v12, %v3008_v34 }
 0x332   : > { %v1345_v14 = vadd.f32 %v1945_v62, %v1344_v28  ;;  %v1955_v22 = vpop.eup %1954  ;;  %v1398_v57 = vpack.c.bf16 %v1953_v0, %v1951_v20  ;;  %v1321_v62 = vadd.f32 %v1320_v17, %v2793_v46 }
 0x333   : > { %v1957_v32 = vpop.eup %1956  ;;  %v1390_v18 = vpack.c.bf16 %v1955_v22, %v1949_v1 }
 0x334   : > { %v1346_v39 = vadd.f32 %v1947_v30, %v1345_v14  ;;  %1432 = vmatpush1.bf16.msra.mxu0 %v1369_v50  ;;  %v1959_v53 = vpop.eup %1958  ;;  %v1322_v14 = vrot.slane %v1321_v62, 2 }
 0x335   : > { %1433 = vmatprep.subr.bf16.mxu0 %v1368_v35  ;;  %v1961_v27 = vpop.eup %1960 }
 0x336   : > { %v1347_v56 = vadd.f32 %v1949_v1, %v1346_v39  ;;  %v1963_v13 = vpop.eup %1962  ;;  %v1396_v24 = vpack.c.bf16 %v1961_v27, %v1959_v53  ;;  %v1323_v50 = vadd.f32 %v1322_v14, %v1321_v62 }
 0x337   : > { %v1392_v47 = vpack.c.bf16 %v1963_v13, %v1957_v32 }
 0x338   : > { %v1348_v45 = vadd.f32 %v1955_v22, %v1347_v56  ;;  %1434 = vmatpush1.bf16.msra.mxu0 %v1367_v19  ;;  %v1324_v39 = vrot.slane %v1323_v50, 1  ;;  %v646_v19 = vld [vmem:[%s2203_s9] sm:$0xff] }
 0x339   : > { %1435 = vmatprep.subr.bf16.mxu0 %v1398_v57 }
 0x33a   : > { %v1349_v23 = vadd.f32 %v1957_v32, %v1348_v45  ;;  %v1475_v32 = vstv %s1472_s13 }
 0x33c   : > { %v1350_v37 = vadd.f32 %v1963_v13, %v1349_v23  ;;  %1436 = vmatpush2.bf16.msra.mxu0 %v1397_v11 }
 0x33d   : > { %1437 = vmatprep.subr.bf16.mxu0 %v1396_v24 }
 0x33e   : > { %v1351_v3 = vadd.f32 %v2779_v59, %v1350_v37  ;;  %v3001_v59 = vpack.c.bf16 %v2635_v9, %v2630_v15  ;;  %v648_v37 = vld [vmem:[%s2203_s9 + $0x10] sm:$0xff] }
 0x340   : > { %v1352_v21 = vadd.f32 %v2783_v43, %v1351_v3  ;;  %1438 = vmatpush2.bf16.msra.mxu0 %v1395_v10  ;;  %v284_v43 = vpop.permute.xlu0 %283 }
 0x341   : > { %1439 = vmatprep.subr.bf16.mxu0 %v1394_v25  ;;  %v374_v25 = vpop.f32.mrf.mxu0  ;;  %v373_v60 = vadd.f32 %v372_v7, %v284_v43  ;;  %v371_v28 = vadd.f32 %v370_v40, %v284_v43 }
 0x342   : > { %v1353_v38 = vadd.f32 %v1959_v53, %v1352_v21  ;;  %v649_v21 = vld [vmem:[%s2203_s9 + $0x18] sm:$0xff] }
 0x343   : > { %v376_v2 = vpop.f32.mrf.mxu0 }
 0x344   : > { %v1354_v44 = vadd.f32 %v1961_v27, %v1353_v38  ;;  %1440 = vmatpush2.bf16.msra.mxu0 %v2999_v61  ;;  %v289_v15 = vpop.permute.xlu0 %288  ;;  %v647_v27 = vld [vmem:[%s2203_s9 + $0x8] sm:$0xff]  ;;  %v650_v61 = vld [vmem:[%s2203_s9 + $0x20] sm:$0xff] }
 0x345   : > { %1441 = vmatprep.subr.bf16.mxu0 %v1392_v47  ;;  %v377_v9 = vadd.f32 %v376_v2, %v289_v15  ;;  %v375_v51 = vadd.f32 %v374_v25, %v289_v15  ;;  %v653_v25 = vld [vmem:[%s2203_s9 + $0x38] sm:$0xff] }
 0x346   : > { %v1355_v58 = vadd.f32 %v1951_v20, %v1354_v44 }
 0x347   : > { %v1747_v6 = vpack.c.bf16 %v377_v9, %v373_v60  ;;  %v1746_v29 = vpack.c.bf16 %v375_v51, %v371_v28 }
 0x348   : > { %v1356_v48 = vadd.f32 %v1953_v0, %v1355_v58  ;;  %1442 = vmatpush2.bf16.msra.mxu0 %v3000_v36  ;;  %v1325_v0 = vadd.f32 %v1324_v39, %v1323_v50 }
 0x349   : > { %1443 = vmatprep.subr.bf16.mxu0 %v1390_v18  ;;  %v651_v18 = vld [vmem:[%s2203_s9 + $0x28] sm:$0xff] }
 0x34a   : > { %v1357_v49 = vrot.slane %v1356_v48, 4  ;;  %1964 = vrcp.f32 %v1325_v0 }
 0x34c   : > { %1444 = vmatpush2.bf16.msra.mxu0 %v3001_v59  ;;  %v1358_v30 = vadd.f32 %v1357_v49, %v1356_v48  ;;  %v652_v59 = vld [vmem:[%s2203_s9 + $0x30] sm:$0xff]  ;;  %s2082_s9 = smov [#allocation9]  }
 0x34d   : > { %1445 = vmatprep.subr.bf16.mxu0 %v1388_v5  ;;  %s2000_s26 = sshll.u32 %s2082_s9, 4  ;;  %s2001_s26 = int_to_ptr.vmem [resolvable:$false] %s2000_s26 }
 0x34e   : > { %v1359_v1 = vrot.slane %v1358_v30, 2  ;;  %s2002_s27 = scalar_lea.vmem %s2001_s26, 2048  ;;  %p2003_p1 = scmp.lt.s32.totalorder %s2871_s7, %s2001_s26 }
 0x34f   : > { %p2004_p3 = scmp.lt.s32.totalorder %s2002_s27, %s1996_s20 }
 0x350   : > { %1446 = vmatpush2.bf16.msra.mxu0 %v1387_v52  ;;  %v1360_v20 = vadd.f32 %v1359_v1, %v1358_v30 }
 0x351   : > { %1447 = vmatprep.subr.bf16.mxu0 %v1386_v63  ;;  %p2005_p5 = por %p2004_p3, %p2003_p1 }
 0x352   : > { %v1361_v35 = vrot.slane %v1360_v20, 1 }
 0x353   : > { %p2006_p6 = pnand %p2005_p5, %p1999_p0 }
 0x354   : > { %1448 = vmatpush2.bf16.msra.mxu0 %v1385_v33  ;;  %v1362_v22 = vadd.f32 %v1361_v35, %v1360_v20 }
 0x355   : > { %1449 = vmatprep.subr.bf16.mxu0 %v1384_v26 }
 0x356   : > { %1966 = vrcp.f32 %v1362_v22 }
 0x357   : > { %v1965_v56 = vpop.eup %1964 }
 0x358   : > { %1450 = vmatpush2.bf16.msra.mxu0 %v1383_v16  ;;  %v1476_v46 = vmul.f32 %v1965_v56, %v1475_v32 }
 0x35b   : > { %1452 = vmatmul.mubr.bf16.vlgmr.msra.gmra.mxu0 %v3009_v42 }
 0x35c   : > { %1461 = vmatprep.mubr.bf16.mxu0 %v1747_v6 }
 0x363   : > { %1462 = vmatmul.mubr.bf16.gmra.mxu0 %v1746_v29  ;;  %v1967_v55 = vpop.eup %1966 }
 0x364   : > { %v1477_v57 = vmul.f32 %v1967_v55, %v1475_v32 }
 0x41b   : > { %v1453_v53 = vpop.f32.mrf.mxu0 }
 0x41c   : > { %v1478_v45 = vmul.f32 %v1476_v46, %v1453_v53 }
 0x41d   : > { %v1455_v23 = vpop.f32.mrf.mxu0 }
 0x41e   : > { %v1486_v13 = vadd.f32 %v1478_v45, %v646_v19  ;;  %v1479_v11 = vmul.f32 %v1477_v57, %v1455_v23 }
 0x41f   : > { %v1457_v24 = vpop.f32.mrf.mxu0 }
 0x420   : > { %1494 = vst [vmem:[%s2857_s14] sm:$0xff] %v1486_v13  ;;  %v1487_v3 = vadd.f32 %v1479_v11, %v647_v27  ;;  %v1480_v10 = vmul.f32 %v1476_v46, %v1457_v24 }
 0x421   : > { %v1459_v38 = vpop.f32.mrf.mxu0 }
 0x422   : > { %1495 = vst [vmem:[%s2857_s14 + $0x8] sm:$0xff] %v1487_v3  ;;  %v1488_v44 = vadd.f32 %v1480_v10, %v648_v37  ;;  %v1481_v47 = vmul.f32 %v1477_v57, %v1459_v38 }
 0x423   : > { %v1463_v58 = vpop.f32.mrf.mxu0 }
 0x424   : > { %1496 = vst [vmem:[%s2857_s14 + $0x10] sm:$0xff] %v1488_v44  ;;  %v1489_v40 = vadd.f32 %v1481_v47, %v649_v21  ;;  %v1482_v48 = vmul.f32 %v1476_v46, %v1463_v58 }
 0x425   : > { %v1465_v36 = vpop.f32.mrf.mxu0 }
 0x426   : > { %1497 = vst [vmem:[%s2857_s14 + $0x18] sm:$0xff] %v1489_v40  ;;  %v1490_v7 = vadd.f32 %v1482_v48, %v650_v61  ;;  %v1483_v5 = vmul.f32 %v1477_v57, %v1465_v36 }
 0x427   : > { %v1467_v31 = vpop.f32.mrf.mxu0 }
 0x428   : > { %1498 = vst [vmem:[%s2857_s14 + $0x20] sm:$0xff] %v1490_v7  ;;  %v1491_v52 = vadd.f32 %v1483_v5, %v651_v18  ;;  %v1484_v43 = vmul.f32 %v1476_v46, %v1467_v31 }
 0x429   : > { %v1469_v63 = vpop.f32.mrf.mxu0 }
 0x42a   : > { %1499 = vst [vmem:[%s2857_s14 + $0x28] sm:$0xff] %v1491_v52  ;;  %v1492_v41 = vadd.f32 %v1484_v43, %v652_v59  ;;  %v1485_v4 = vmul.f32 %v1477_v57, %v1469_v63 }
 0x42c   : > { %1500 = vst [vmem:[%s2857_s14 + $0x30] sm:$0xff] %v1492_v41  ;;  %v1493_v33 = vadd.f32 %v1485_v4, %v653_v25 }
 0x42e   : > { %1501 = vst [vmem:[%s2857_s14 + $0x38] sm:$0xff] %v1493_v33 }
 0x42f   : > { %2009 = shalt.err (!%p2006_p6)
}
 0x430   : > { %s2010_s8 = scalar_lea.hbm %s2877_s23, 1024  ;;  %s2014_s11 = scalar_lea.hbm %s2931_s4, 2048 }
 0x431   : > { %p2011_p7 = scmp.ne.s32.totalorder %s2877_s23, %s2010_s8  ;;  %p2015_p13 = scmp.lt.s32.totalorder %s2877_s23, %s2931_s4 }
 0x432   : > { %p2016_p2 = scmp.lt.s32.totalorder %s2014_s11, %s2010_s8 }
 0x433   : > { %p2012_p10 = pnand %p2011_p7, %p2164_p9 }
 0x434   : > { %p2017_p8 = por %p2016_p2, %p2015_p13 }
 0x435   : > { %p2013_p4 = pneg %p2012_p10 }
 0x437   : > { %p2018_p12 = pnand %p2017_p8, %p2013_p4 }
 0x439   : > { %2021 = shalt.err (!%p2018_p12)
}
 0x43a   : > { %s2083_s14 = smov 256   ;;  %s2084_s15 = smov 16  }
 0x43b   : > { %1750 = dma.vmem_to_hbm [thread:$0]  (%p2164_p9), %s2871_s7, 1024, %s2877_s23, %s1503_s25, %s2083_s14, %s2083_s14, %s2084_s15  }
 0x43c PF: > { %s1533_s16 = sand.u32 1, %s2056_s17   ;;  %p3010_p0 = scmp.ge.s32.totalorder %s2076_s22, 2 }
 0x43d   : > { %s1534_s3 = scalar_lea.sflag [#allocation8], %s1533_s16 }
 0x43e   : > { %p1757_p1 = pnand %p3010_p0, %p2171_p11 }
 0x440   : > { %p1758_p3 = pneg %p1757_p1 }
 0x442   : > { %2051 = dma.done.wait (%p1758_p3), %s1534_s3, 1024  }
 0x443   : > { %2053 = vsyncadd (%p1758_p3), %s1534_s3, 4294966272  ;;  %s21_s22 = sadd.s32 1, %s2076_s22   ;;  %s3011_s17 = smov %s2060_s18 }
 0x444   : > { %p18_p5 = scmp.ge.s32.totalorder %s21_s22, 4   ;;  %s3012_s18 = smov %s2064_s19 }
 0x445   : > { %s3013_s19 = smov %s2169_s30  ;;  %s3014_s20 = smov %s2072_s21 }
 0x446   : > { %s3015_s21 = smov %s3017_s24  ;;  %20 = sbr.rel (!%p18_p5) target bundleno = 8 (0x8), region = 87 }
 0x44b   :  { %1539 = vsyncpa [#allocation7], 1 }
 0x44c   :  { %1541 = vsyncpa [#allocation7 + $0x1], 1 }
 0x44d   :  { %1542 = vsyncpa [#allocation8], 1 }
 0x44e   :  { %1544 = vsyncpa [#allocation8 + $0x1], 1 }

</bundles_post_ra>
